<compile_context>
chip_gen: v7x
topology: tpu7x:2x2x1
jax: 0.10.0
libtpu: 0.0.40
codegen_flags: <defaults>
</compile_context>

<pallas_src>
import math
from functools import partial

import jax
import jax.numpy as jnp
from jax.experimental import pallas as pl
from jax.experimental.pallas import tpu as pltpu


# ----------------------------------------------------------------------------
# Pallas kernel: one (Bt, N, D) batch tile per grid step.
# ----------------------------------------------------------------------------
def _attentive_classifier_kernel(
    patch_ref,   # (Bt, N, D)  patch tokens for this batch tile
    cls_ref,     # (Bt, D)     class tokens
    q0_ref,      # (1, D)      raw query token (residual stream, f32)
    ws_ref,      # (D, H)      masked + pre-scaled projected query (score weight)
    e_ref,       # (H, D)      head -> embed expansion matrix (0/1)
    g1_ref, b1_ref,            # norm1 weight/bias          (1, D)
    wkv_ref, bkv_ref,          # fused kv linear            (D, 2D) / (1, 2D)
    wp_ref, bp_ref,            # attn output projection     (D, D)  / (1, D)
    g2_ref, b2_ref,            # norm2 weight/bias          (1, D)
    w1_ref, c1_ref,            # mlp fc1                    (D, Hid)/ (1, Hid)
    w2_ref, c2_ref,            # mlp fc2                    (Hid, D)/ (1, D)
    wlp_ref, wlc_ref, bl_ref,  # classifier split           (D, Cp), (D, Cp), (1, Cp)
    out_ref,     # (Bt, Cp)
    *, num_heads, approx_recip,
):
    f32 = jnp.float32
    eps = 1e-5
    inv_sqrt2 = 0.7071067811865476
    Bt, N, D = patch_ref.shape
    mxu_dt = wkv_ref.dtype     # bf16 or f32 MXU operand dtype

    # ---- norm1 over all Bt*N patch tokens at once (f32 math) -----------------
    x = patch_ref[...].reshape(Bt * N, D).astype(f32)
    mu = jnp.mean(x, axis=-1, keepdims=True)
    var = jnp.mean(jnp.square(x - mu), axis=-1, keepdims=True)
    xn = (x - mu) * jax.lax.rsqrt(var + eps) * g1_ref[...] + b1_ref[...]

    # ---- fused K/V projection: ONE (Bt*N, D) x (D, 2D) matmul ----------------
    kv = jnp.dot(xn.astype(mxu_dt), wkv_ref[...],
                 preferred_element_type=f32) + bkv_ref[...]
    k = kv[:, :D]                                            # (Bt*N, D)
    v = kv[:, D:]                                            # (Bt*N, D)

    # ---- all-head attention scores in ONE matmul ------------------------------
    # ws[d, h] = scale * Qproj[d] * (d // Dh == h)  =>  s[m, h] = scale * Qh . Kh(m)
    s = jnp.dot(k.astype(mxu_dt), ws_ref[...], preferred_element_type=f32)
    s3 = s.reshape(Bt, N, num_heads)
    m = jnp.max(s3, axis=1, keepdims=True)                   # (Bt, 1, H)
    p = jnp.exp(s3 - m)
    denom = jnp.sum(p, axis=1, keepdims=True)                # (Bt, 1, H)
    p = p * pl.reciprocal(denom, approx=approx_recip)

    # ---- per-head context: expand probs to embed width, reduce over keys ------
    pe = jnp.dot(p.reshape(Bt * N, num_heads).astype(mxu_dt), e_ref[...],
                 preferred_element_type=f32)                 # (Bt*N, D)
    ctx = jnp.sum(pe.reshape(Bt, N, D) * v.reshape(Bt, N, D), axis=1)   # (Bt, D)

    # ---- attention output projection + residual 1 ------------------------------
    attn = jnp.dot(ctx.astype(mxu_dt), wp_ref[...],
                   preferred_element_type=f32) + bp_ref[...]
    q1 = q0_ref[...] + attn                                  # (Bt, D)

    # ---- norm2 + MLP (fc1 -> exact GELU -> fc2) + residual 2 -------------------
    mu2 = jnp.mean(q1, axis=-1, keepdims=True)
    var2 = jnp.mean(jnp.square(q1 - mu2), axis=-1, keepdims=True)
    qn = (q1 - mu2) * jax.lax.rsqrt(var2 + eps) * g2_ref[...] + b2_ref[...]

    h1 = jnp.dot(qn.astype(mxu_dt), w1_ref[...],
                 preferred_element_type=f32) + c1_ref[...]               # (Bt, Hid)
    h1 = 0.5 * h1 * (1.0 + jax.lax.erf(h1 * inv_sqrt2))                  # exact GELU
    mlp = jnp.dot(h1.astype(mxu_dt), w2_ref[...],
                  preferred_element_type=f32) + c2_ref[...]              # (Bt, D)
    pooled = q1 + mlp                                                    # (Bt, D)

    # ---- classifier on concat([pooled, class_token]) (split weight) ------------
    cls_m = cls_ref[...].astype(mxu_dt)
    logits = (jnp.dot(pooled.astype(mxu_dt), wlp_ref[...], preferred_element_type=f32)
              + jnp.dot(cls_m, wlc_ref[...], preferred_element_type=f32)
              + bl_ref[...])                                             # (Bt, Cp)
    out_ref[...] = logits


# ----------------------------------------------------------------------------
# One-time parameter preparation (transposes / splits / padding / casting).
# ----------------------------------------------------------------------------
def prepare_params(params, num_heads, *, mxu_dtype=jnp.float32, lane_pad=128):
    f32 = jnp.float32
    D = params["norm1_w"].shape[0]
    hid = params["fc1_b"].shape[0]
    C = params["lin_b"].shape[0]
    H = num_heads
    Dh = D // H

    def w(a):  # MXU-side weights (optionally bf16)
        return a.astype(mxu_dtype)

    # Batch-invariant Q projection hoisted out of the kernel; folded with the
    # attention scale into a block-diagonally-masked score weight ws (D, H):
    #   ws[d, h] = scale * Qproj[d] * (d // Dh == h)
    q0 = params["query_tokens"].reshape(1, D).astype(f32)
    qproj = q0 @ params["q_w"].T.astype(f32) + params["q_b"].astype(f32)   # (1, D)
    head_of = jnp.arange(D) // Dh
    mask = (head_of[:, None] == jnp.arange(H)[None, :]).astype(f32)        # (D, H)
    ws = (qproj.reshape(D, 1) * mask) * (Dh ** -0.5)
    e = mask.T                                                             # (H, D)

    # Classifier: split along the concat axis, pad classes to a lane-dense width.
    Cp = ((C + lane_pad - 1) // lane_pad) * lane_pad
    Cp = max(Cp, lane_pad)
    wl = jnp.pad(params["lin_w"].T.astype(f32), ((0, 0), (0, Cp - C)))     # (2D, Cp)
    bl = jnp.pad(params["lin_b"].astype(f32), (0, Cp - C)).reshape(1, Cp)

    prepped = dict(
        q0=q0,
        ws=w(ws), e=w(e),
        g1=params["norm1_w"].reshape(1, D).astype(f32),
        b1=params["norm1_b"].reshape(1, D).astype(f32),
        wkv=w(params["kv_w"].T), bkv=params["kv_b"].reshape(1, 2 * D).astype(f32),
        wp=w(params["proj_w"].T), bp=params["proj_b"].reshape(1, D).astype(f32),
        g2=params["norm2_w"].reshape(1, D).astype(f32),
        b2=params["norm2_b"].reshape(1, D).astype(f32),
        w1=w(params["fc1_w"].T), c1=params["fc1_b"].reshape(1, hid).astype(f32),
        w2=w(params["fc2_w"].T), c2=params["fc2_b"].reshape(1, D).astype(f32),
        wlp=w(wl[:D]), wlc=w(wl[D:]), bl=bl,
    )
    meta = dict(num_heads=H, num_classes=C, padded_classes=Cp,
                mxu_dtype=jnp.dtype(mxu_dtype))
    return prepped, meta


# ----------------------------------------------------------------------------
# Forward wrapper: batch padding + pallas_call over batch tiles.
# ----------------------------------------------------------------------------
def attentive_classifier_forward(patch_tokens, class_token, prepped, meta, *, block_b=8):
    f32 = jnp.float32
    B, N, D = patch_tokens.shape
    H = meta["num_heads"]
    C = meta["num_classes"]
    Cp = meta["padded_classes"]
    mxu_dtype = meta["mxu_dtype"]

    Bt = int(block_b)
    assert Bt >= 8 and Bt % 8 == 0, "batch tile must be a multiple of 8"
    n_blocks = -(-B // Bt)
    B_pad = n_blocks * Bt
    if B_pad != B:
        patch_tokens = jnp.pad(patch_tokens, ((0, B_pad - B), (0, 0), (0, 0)))
        class_token = jnp.pad(class_token, ((0, B_pad - B), (0, 0)))

    # Stream activations at MXU dtype: in bf16 mode this halves the dominant
    # HBM->VMEM traffic (patch tokens).  LayerNorm math is still f32 in-kernel.
    act_dtype = f32 if mxu_dtype == jnp.float32 else jnp.bfloat16
    patch_tokens = patch_tokens.astype(act_dtype)
    class_token = class_token.astype(act_dtype)

    weight_names = ["q0", "ws", "e", "g1", "b1", "wkv", "bkv", "wp", "bp",
                    "g2", "b2", "w1", "c1", "w2", "c2", "wlp", "wlc", "bl"]
    weights = [prepped[n] for n in weight_names]

    def const_spec(arr):
        zeros = (0,) * arr.ndim
        return pl.BlockSpec(arr.shape, lambda b, z=zeros: z)

    in_specs = ([pl.BlockSpec((Bt, N, D), lambda b: (b, 0, 0)),
                 pl.BlockSpec((Bt, D), lambda b: (b, 0))]
                + [const_spec(a) for a in weights])
    out_spec = pl.BlockSpec((Bt, Cp), lambda b: (b, 0))

    # VMEM budget: double-buffered batch blocks + resident weights + headroom.
    act_itemsize = jnp.dtype(act_dtype).itemsize
    block_bytes = (Bt * N * D + Bt * D) * act_itemsize + Bt * Cp * 4
    weight_bytes = sum(int(a.size) * a.dtype.itemsize for a in weights)
    vmem_limit = int(min(64 << 20,
                         max(32 << 20,
                             2 * (block_bytes + weight_bytes)
                             + 8 * block_bytes + (8 << 20))))

    approx_recip = bool(mxu_dtype == jnp.bfloat16)

    out = pl.pallas_call(
        partial(_attentive_classifier_kernel, num_heads=H, approx_recip=approx_recip),
        out_shape=jax.ShapeDtypeStruct((B_pad, Cp), f32),
        grid=(n_blocks,),
        in_specs=in_specs,
        out_specs=out_spec,
        compiler_params=pltpu.CompilerParams(
            dimension_semantics=("parallel",),
            vmem_limit_bytes=vmem_limit),
    )(patch_tokens, class_token, *weights)
    return out[:B, :C]


# ----------------------------------------------------------------------------
# Deterministic synthetic parameter init (mirrors the module's __init__).
# ----------------------------------------------------------------------------
def init_params(key, D, mlp_ratio, C, init_std=0.02):
    hid = int(D * mlp_ratio)
    ks = jax.random.split(key, 8)

    def tn(k, shape):
        return init_std * jax.random.truncated_normal(k, -2.0, 2.0, shape, jnp.float32)

    p = {}
    p["query_tokens"] = tn(ks[0], (1, 1, D))
    p["norm1_w"] = jnp.ones((D,), jnp.float32)
    p["norm1_b"] = jnp.zeros((D,), jnp.float32)
    p["q_w"] = tn(ks[1], (D, D));       p["q_b"] = jnp.zeros((D,), jnp.float32)
    p["kv_w"] = tn(ks[2], (2 * D, D));  p["kv_b"] = jnp.zeros((2 * D,), jnp.float32)
    # _rescale_blocks: proj and fc2 weights divided by sqrt(2 * layer_id), layer_id = 1
    p["proj_w"] = tn(ks[3], (D, D)) / math.sqrt(2.0)
    p["proj_b"] = jnp.zeros((D,), jnp.float32)
    p["norm2_w"] = jnp.ones((D,), jnp.float32)
    p["norm2_b"] = jnp.zeros((D,), jnp.float32)
    p["fc1_w"] = tn(ks[4], (hid, D));   p["fc1_b"] = jnp.zeros((hid,), jnp.float32)
    p["fc2_w"] = tn(ks[5], (D, hid)) / math.sqrt(2.0)
    p["fc2_b"] = jnp.zeros((D,), jnp.float32)
    p["lin_w"] = tn(ks[6], (C, 2 * D)); p["lin_b"] = jnp.zeros((C,), jnp.float32)
    return p


# ----------------------------------------------------------------------------
# Pure-JAX reference (PyTorch conventions) for verification.
# ----------------------------------------------------------------------------
def reference_forward(patch_tokens, class_token, params, num_heads):
    B, N, D = patch_tokens.shape
    Dh = D // num_heads

    def ln(x, w, b):
        mu = x.mean(-1, keepdims=True)
        var = ((x - mu) ** 2).mean(-1, keepdims=True)
        return (x - mu) / jnp.sqrt(var + 1e-5) * w + b

    xn = ln(patch_tokens, params["norm1_w"], params["norm1_b"])
    q0 = jnp.broadcast_to(params["query_tokens"], (B, 1, D))
    Q = q0 @ params["q_w"].T + params["q_b"]
    KV = xn @ params["kv_w"].T + params["kv_b"]
    K, V = KV[..., :D], KV[..., D:]
    Qh = Q.reshape(B, 1, num_heads, Dh).transpose(0, 2, 1, 3)
    Kh = K.reshape(B, N, num_heads, Dh).transpose(0, 2, 1, 3)
    Vh = V.reshape(B, N, num_heads, Dh).transpose(0, 2, 1, 3)
    s = (Qh @ Kh.transpose(0, 1, 3, 2)) * (Dh ** -0.5)
    p = jax.nn.softmax(s, axis=-1)
    ctx = (p @ Vh).transpose(0, 2, 1, 3).reshape(B, 1, D)
    attn = ctx @ params["proj_w"].T + params["proj_b"]
    q1 = q0 + attn
    qn = ln(q1, params["norm2_w"], params["norm2_b"])
    h1 = qn @ params["fc1_w"].T + params["fc1_b"]
    h1 = 0.5 * h1 * (1.0 + jax.lax.erf(h1 * 0.7071067811865476))
    mlp = h1 @ params["fc2_w"].T + params["fc2_b"]
    pooled = (q1 + mlp)[:, 0, :]
    combined = jnp.concatenate([pooled, class_token], axis=-1)
    return combined @ params["lin_w"].T + params["lin_b"]


if __name__ == "__main__":
    # Small shapes consistent with the module: B=2, seq N=8, embed D=32,
    # heads=4, mlp_ratio=4 (hidden 128), num_classes=16.
    B, N, D, H, C = 2, 8, 32, 4, 16
    mlp_ratio = 4.0

    key = jax.random.PRNGKey(0)
    kx, kc, kp = jax.random.split(key, 3)
    patch_tokens = jax.random.normal(kx, (B, N, D), jnp.float32)
    class_token = jax.random.normal(kc, (B, D), jnp.float32)
    params = init_params(kp, D, mlp_ratio, C)

    ref = reference_forward(patch_tokens, class_token, params, H)

    # f32 MXU operands: tight check against the pure-JAX reference.
    prepped, meta = prepare_params(params, H, mxu_dtype=jnp.float32)
    out = attentive_classifier_forward(patch_tokens, class_token, prepped, meta, block_b=8)
    out = jax.block_until_ready(out)
    assert out.shape == (B, C)
    err = float(jnp.max(jnp.abs(out - ref)))
    assert jnp.allclose(out, ref, rtol=1e-4, atol=2e-4), err

    # bf16 MXU operands + bf16 activation streaming (f32 accumulation): relaxed check.
    prepped_bf, meta_bf = prepare_params(params, H, mxu_dtype=jnp.bfloat16)
    out_bf = attentive_classifier_forward(patch_tokens, class_token, prepped_bf, meta_bf, block_b=8)
    out_bf = jax.block_until_ready(out_bf)
    err_bf = float(jnp.max(jnp.abs(out_bf - ref)))
    assert jnp.allclose(out_bf, ref, rtol=5e-2, atol=5e-2), err_bf

    print("KERNEL_OK")
</pallas_src>

<mosaic_0001>
module attributes {stable_mosaic.version = 11 : i64} {
  func.func @_attentive_classifier_kernel(%arg0: i32, %arg1: memref<8x8x32xf32, #tpu.memory_space<vmem>>, %arg2: memref<8x32xf32, #tpu.memory_space<vmem>>, %arg3: memref<1x32xf32, #tpu.memory_space<vmem>>, %arg4: memref<32x4xf32, #tpu.memory_space<vmem>>, %arg5: memref<4x32xf32, #tpu.memory_space<vmem>>, %arg6: memref<1x32xf32, #tpu.memory_space<vmem>>, %arg7: memref<1x32xf32, #tpu.memory_space<vmem>>, %arg8: memref<32x64xf32, #tpu.memory_space<vmem>>, %arg9: memref<1x64xf32, #tpu.memory_space<vmem>>, %arg10: memref<32x32xf32, #tpu.memory_space<vmem>>, %arg11: memref<1x32xf32, #tpu.memory_space<vmem>>, %arg12: memref<1x32xf32, #tpu.memory_space<vmem>>, %arg13: memref<1x32xf32, #tpu.memory_space<vmem>>, %arg14: memref<32x128xf32, #tpu.memory_space<vmem>>, %arg15: memref<1x128xf32, #tpu.memory_space<vmem>>, %arg16: memref<128x32xf32, #tpu.memory_space<vmem>>, %arg17: memref<1x32xf32, #tpu.memory_space<vmem>>, %arg18: memref<32x128xf32, #tpu.memory_space<vmem>>, %arg19: memref<32x128xf32, #tpu.memory_space<vmem>>, %arg20: memref<1x128xf32, #tpu.memory_space<vmem>>, %arg21: memref<8x128xf32, #tpu.memory_space<vmem>>) attributes {dimension_semantics = [#tpu.dimension_semantics<parallel>], iteration_bounds = array<i64: 1>, scalar_prefetch = 0 : i64, scratch_operands = 0 : i64, tpu.core_type = #tpu.core_type<tc>, window_params = [{transform_indices = @transform_0, window_bounds = array<i64: 8, 8, 32>}, {transform_indices = @transform_1, window_bounds = array<i64: 8, 32>}, {pipeline_mode = #tpu.pipeline_mode<synchronous>, transform_indices = @transform_2, window_bounds = array<i64: 1, 32>}, {pipeline_mode = #tpu.pipeline_mode<synchronous>, transform_indices = @transform_3, window_bounds = array<i64: 32, 4>}, {pipeline_mode = #tpu.pipeline_mode<synchronous>, transform_indices = @transform_4, window_bounds = array<i64: 4, 32>}, {pipeline_mode = #tpu.pipeline_mode<synchronous>, transform_indices = @transform_5, window_bounds = array<i64: 1, 32>}, {pipeline_mode = #tpu.pipeline_mode<synchronous>, transform_indices = @transform_6, window_bounds = array<i64: 1, 32>}, {pipeline_mode = #tpu.pipeline_mode<synchronous>, transform_indices = @transform_7, window_bounds = array<i64: 32, 64>}, {pipeline_mode = #tpu.pipeline_mode<synchronous>, transform_indices = @transform_8, window_bounds = array<i64: 1, 64>}, {pipeline_mode = #tpu.pipeline_mode<synchronous>, transform_indices = @transform_9, window_bounds = array<i64: 32, 32>}, {pipeline_mode = #tpu.pipeline_mode<synchronous>, transform_indices = @transform_10, window_bounds = array<i64: 1, 32>}, {pipeline_mode = #tpu.pipeline_mode<synchronous>, transform_indices = @transform_11, window_bounds = array<i64: 1, 32>}, {pipeline_mode = #tpu.pipeline_mode<synchronous>, transform_indices = @transform_12, window_bounds = array<i64: 1, 32>}, {pipeline_mode = #tpu.pipeline_mode<synchronous>, transform_indices = @transform_13, window_bounds = array<i64: 32, 128>}, {pipeline_mode = #tpu.pipeline_mode<synchronous>, transform_indices = @transform_14, window_bounds = array<i64: 1, 128>}, {pipeline_mode = #tpu.pipeline_mode<synchronous>, transform_indices = @transform_15, window_bounds = array<i64: 128, 32>}, {pipeline_mode = #tpu.pipeline_mode<synchronous>, transform_indices = @transform_16, window_bounds = array<i64: 1, 32>}, {pipeline_mode = #tpu.pipeline_mode<synchronous>, transform_indices = @transform_17, window_bounds = array<i64: 32, 128>}, {pipeline_mode = #tpu.pipeline_mode<synchronous>, transform_indices = @transform_18, window_bounds = array<i64: 32, 128>}, {pipeline_mode = #tpu.pipeline_mode<synchronous>, transform_indices = @transform_19, window_bounds = array<i64: 1, 128>}, {transform_indices = @transform_20, window_bounds = array<i64: 8, 128>}]} {
    %c0 = arith.constant 0 : index
    %c0_0 = arith.constant 0 : index
    %c0_1 = arith.constant 0 : index
    %0 = vector.load %arg1[%c0, %c0_0, %c0_1] : memref<8x8x32xf32, #tpu.memory_space<vmem>>, vector<8x8x32xf32>
    %1 = vector.shape_cast %0 : vector<8x8x32xf32> to vector<64x32xf32>
    %cst = arith.constant dense<0.000000e+00> : vector<64xf32>
    %2 = vector.multi_reduction <add>, %1, %cst [1] : vector<64x32xf32> to vector<64xf32>
    %3 = vector.shape_cast %2 : vector<64xf32> to vector<64x1xf32>
    %cst_2 = arith.constant 3.200000e+01 : f32
    %4 = vector.broadcast %cst_2 : f32 to vector<64x1xf32>
    %5 = arith.divf %3, %4 : vector<64x1xf32>
    %6 = vector.broadcast %5 : vector<64x1xf32> to vector<64x32xf32>
    %7 = arith.subf %1, %6 : vector<64x32xf32>
    %8 = arith.mulf %7, %7 : vector<64x32xf32>
    %cst_3 = arith.constant dense<0.000000e+00> : vector<64xf32>
    %9 = vector.multi_reduction <add>, %8, %cst_3 [1] : vector<64x32xf32> to vector<64xf32>
    %10 = vector.shape_cast %9 : vector<64xf32> to vector<64x1xf32>
    %cst_4 = arith.constant 3.200000e+01 : f32
    %11 = vector.broadcast %cst_4 : f32 to vector<64x1xf32>
    %12 = arith.divf %10, %11 : vector<64x1xf32>
    %13 = vector.broadcast %5 : vector<64x1xf32> to vector<64x32xf32>
    %14 = arith.subf %1, %13 : vector<64x32xf32>
    %cst_5 = arith.constant 9.99999974E-6 : f32
    %15 = vector.broadcast %cst_5 : f32 to vector<64x1xf32>
    %16 = arith.addf %12, %15 : vector<64x1xf32>
    %17 = math.rsqrt %16 : vector<64x1xf32>
    %18 = vector.broadcast %17 : vector<64x1xf32> to vector<64x32xf32>
    %19 = arith.mulf %14, %18 : vector<64x32xf32>
    %c0_6 = arith.constant 0 : index
    %c0_7 = arith.constant 0 : index
    %20 = vector.load %arg6[%c0_6, %c0_7] : memref<1x32xf32, #tpu.memory_space<vmem>>, vector<1x32xf32>
    %21 = vector.broadcast %20 : vector<1x32xf32> to vector<64x32xf32>
    %22 = arith.mulf %19, %21 : vector<64x32xf32>
    %c0_8 = arith.constant 0 : index
    %c0_9 = arith.constant 0 : index
    %23 = vector.load %arg7[%c0_8, %c0_9] : memref<1x32xf32, #tpu.memory_space<vmem>>, vector<1x32xf32>
    %24 = vector.broadcast %23 : vector<1x32xf32> to vector<64x32xf32>
    %25 = arith.addf %22, %24 : vector<64x32xf32>
    %c0_10 = arith.constant 0 : index
    %c0_11 = arith.constant 0 : index
    %26 = vector.load %arg8[%c0_10, %c0_11] : memref<32x64xf32, #tpu.memory_space<vmem>>, vector<32x64xf32>
    %cst_12 = arith.constant dense<0.000000e+00> : vector<64x64xf32>
    %27 = tpu.matmul %25, %26, %cst_12 {dimension_numbers = #tpu.dot_dimension_numbers<[1], [0], [0], [1], [0, 0, 1, 1], [], []>} : vector<64x32xf32>, vector<32x64xf32>, vector<64x64xf32> -> vector<64x64xf32>
    %c0_13 = arith.constant 0 : index
    %c0_14 = arith.constant 0 : index
    %28 = vector.load %arg9[%c0_13, %c0_14] : memref<1x64xf32, #tpu.memory_space<vmem>>, vector<1x64xf32>
    %29 = vector.broadcast %28 : vector<1x64xf32> to vector<64x64xf32>
    %30 = arith.addf %27, %29 : vector<64x64xf32>
    %31 = vector.extract_strided_slice %30 {offsets = [0, 0], sizes = [64, 32], strides = [1, 1]} : vector<64x64xf32> to vector<64x32xf32>
    %32 = vector.extract_strided_slice %30 {offsets = [0, 32], sizes = [64, 32], strides = [1, 1]} : vector<64x64xf32> to vector<64x32xf32>
    %c0_15 = arith.constant 0 : index
    %c0_16 = arith.constant 0 : index
    %33 = vector.load %arg4[%c0_15, %c0_16] : memref<32x4xf32, #tpu.memory_space<vmem>>, vector<32x4xf32>
    %cst_17 = arith.constant dense<0.000000e+00> : vector<64x4xf32>
    %34 = tpu.matmul %31, %33, %cst_17 {dimension_numbers = #tpu.dot_dimension_numbers<[1], [0], [0], [1], [0, 0, 1, 1], [], []>} : vector<64x32xf32>, vector<32x4xf32>, vector<64x4xf32> -> vector<64x4xf32>
    %35 = vector.shape_cast %34 : vector<64x4xf32> to vector<8x8x4xf32>
    %cst_18 = arith.constant dense<0xFF800000> : vector<8x4xf32>
    %36 = vector.multi_reduction <maximumf>, %35, %cst_18 [1] : vector<8x8x4xf32> to vector<8x4xf32>
    %37 = vector.shape_cast %36 : vector<8x4xf32> to vector<8x1x4xf32>
    %38 = vector.broadcast %37 : vector<8x1x4xf32> to vector<8x8x4xf32>
    %39 = arith.subf %35, %38 : vector<8x8x4xf32>
    %40 = math.exp %39 : vector<8x8x4xf32>
    %cst_19 = arith.constant dense<0.000000e+00> : vector<8x4xf32>
    %41 = vector.multi_reduction <add>, %40, %cst_19 [1] : vector<8x8x4xf32> to vector<8x4xf32>
    %42 = vector.shape_cast %41 : vector<8x4xf32> to vector<8x1x4xf32>
    %43 = tpu.reciprocal %42 : vector<8x1x4xf32> -> vector<8x1x4xf32>
    %44 = vector.broadcast %43 : vector<8x1x4xf32> to vector<8x8x4xf32>
    %45 = arith.mulf %40, %44 : vector<8x8x4xf32>
    %46 = vector.shape_cast %45 : vector<8x8x4xf32> to vector<64x4xf32>
    %c0_20 = arith.constant 0 : index
    %c0_21 = arith.constant 0 : index
    %47 = vector.load %arg5[%c0_20, %c0_21] : memref<4x32xf32, #tpu.memory_space<vmem>>, vector<4x32xf32>
    %cst_22 = arith.constant dense<0.000000e+00> : vector<64x32xf32>
    %48 = tpu.matmul %46, %47, %cst_22 {dimension_numbers = #tpu.dot_dimension_numbers<[1], [0], [0], [1], [0, 0, 1, 1], [], []>} : vector<64x4xf32>, vector<4x32xf32>, vector<64x32xf32> -> vector<64x32xf32>
    %49 = vector.shape_cast %48 : vector<64x32xf32> to vector<8x8x32xf32>
    %50 = vector.shape_cast %32 : vector<64x32xf32> to vector<8x8x32xf32>
    %51 = arith.mulf %49, %50 : vector<8x8x32xf32>
    %cst_23 = arith.constant dense<0.000000e+00> : vector<8x32xf32>
    %52 = vector.multi_reduction <add>, %51, %cst_23 [1] : vector<8x8x32xf32> to vector<8x32xf32>
    %c0_24 = arith.constant 0 : index
    %c0_25 = arith.constant 0 : index
    %53 = vector.load %arg10[%c0_24, %c0_25] : memref<32x32xf32, #tpu.memory_space<vmem>>, vector<32x32xf32>
    %cst_26 = arith.constant dense<0.000000e+00> : vector<8x32xf32>
    %54 = tpu.matmul %52, %53, %cst_26 {dimension_numbers = #tpu.dot_dimension_numbers<[1], [0], [0], [1], [0, 0, 1, 1], [], []>} : vector<8x32xf32>, vector<32x32xf32>, vector<8x32xf32> -> vector<8x32xf32>
    %c0_27 = arith.constant 0 : index
    %c0_28 = arith.constant 0 : index
    %55 = vector.load %arg11[%c0_27, %c0_28] : memref<1x32xf32, #tpu.memory_space<vmem>>, vector<1x32xf32>
    %56 = vector.broadcast %55 : vector<1x32xf32> to vector<8x32xf32>
    %57 = arith.addf %54, %56 : vector<8x32xf32>
    %c0_29 = arith.constant 0 : index
    %c0_30 = arith.constant 0 : index
    %58 = vector.load %arg3[%c0_29, %c0_30] : memref<1x32xf32, #tpu.memory_space<vmem>>, vector<1x32xf32>
    %59 = vector.broadcast %58 : vector<1x32xf32> to vector<8x32xf32>
    %60 = arith.addf %59, %57 : vector<8x32xf32>
    %cst_31 = arith.constant dense<0.000000e+00> : vector<8xf32>
    %61 = vector.multi_reduction <add>, %60, %cst_31 [1] : vector<8x32xf32> to vector<8xf32>
    %62 = vector.shape_cast %61 : vector<8xf32> to vector<8x1xf32>
    %cst_32 = arith.constant 3.200000e+01 : f32
    %63 = vector.broadcast %cst_32 : f32 to vector<8x1xf32>
    %64 = arith.divf %62, %63 : vector<8x1xf32>
    %65 = vector.broadcast %64 : vector<8x1xf32> to vector<8x32xf32>
    %66 = arith.subf %60, %65 : vector<8x32xf32>
    %67 = arith.mulf %66, %66 : vector<8x32xf32>
    %cst_33 = arith.constant dense<0.000000e+00> : vector<8xf32>
    %68 = vector.multi_reduction <add>, %67, %cst_33 [1] : vector<8x32xf32> to vector<8xf32>
    %69 = vector.shape_cast %68 : vector<8xf32> to vector<8x1xf32>
    %cst_34 = arith.constant 3.200000e+01 : f32
    %70 = vector.broadcast %cst_34 : f32 to vector<8x1xf32>
    %71 = arith.divf %69, %70 : vector<8x1xf32>
    %72 = vector.broadcast %64 : vector<8x1xf32> to vector<8x32xf32>
    %73 = arith.subf %60, %72 : vector<8x32xf32>
    %cst_35 = arith.constant 9.99999974E-6 : f32
    %74 = vector.broadcast %cst_35 : f32 to vector<8x1xf32>
    %75 = arith.addf %71, %74 : vector<8x1xf32>
    %76 = math.rsqrt %75 : vector<8x1xf32>
    %77 = vector.broadcast %76 : vector<8x1xf32> to vector<8x32xf32>
    %78 = arith.mulf %73, %77 : vector<8x32xf32>
    %c0_36 = arith.constant 0 : index
    %c0_37 = arith.constant 0 : index
    %79 = vector.load %arg12[%c0_36, %c0_37] : memref<1x32xf32, #tpu.memory_space<vmem>>, vector<1x32xf32>
    %80 = vector.broadcast %79 : vector<1x32xf32> to vector<8x32xf32>
    %81 = arith.mulf %78, %80 : vector<8x32xf32>
    %c0_38 = arith.constant 0 : index
    %c0_39 = arith.constant 0 : index
    %82 = vector.load %arg13[%c0_38, %c0_39] : memref<1x32xf32, #tpu.memory_space<vmem>>, vector<1x32xf32>
    %83 = vector.broadcast %82 : vector<1x32xf32> to vector<8x32xf32>
    %84 = arith.addf %81, %83 : vector<8x32xf32>
    %c0_40 = arith.constant 0 : index
    %c0_41 = arith.constant 0 : index
    %85 = vector.load %arg14[%c0_40, %c0_41] : memref<32x128xf32, #tpu.memory_space<vmem>>, vector<32x128xf32>
    %cst_42 = arith.constant dense<0.000000e+00> : vector<8x128xf32>
    %86 = tpu.matmul %84, %85, %cst_42 {dimension_numbers = #tpu.dot_dimension_numbers<[1], [0], [0], [1], [0, 0, 1, 1], [], []>} : vector<8x32xf32>, vector<32x128xf32>, vector<8x128xf32> -> vector<8x128xf32>
    %c0_43 = arith.constant 0 : index
    %c0_44 = arith.constant 0 : index
    %87 = vector.load %arg15[%c0_43, %c0_44] : memref<1x128xf32, #tpu.memory_space<vmem>>, vector<1x128xf32>
    %88 = vector.broadcast %87 : vector<1x128xf32> to vector<8x128xf32>
    %89 = arith.addf %86, %88 : vector<8x128xf32>
    %cst_45 = arith.constant 5.000000e-01 : f32
    %90 = vector.broadcast %cst_45 : f32 to vector<8x128xf32>
    %91 = arith.mulf %90, %89 : vector<8x128xf32>
    %cst_46 = arith.constant 0.707106769 : f32
    %92 = vector.broadcast %cst_46 : f32 to vector<8x128xf32>
    %93 = arith.mulf %89, %92 : vector<8x128xf32>
    %94 = math.erf %93 : vector<8x128xf32>
    %cst_47 = arith.constant 1.000000e+00 : f32
    %95 = vector.broadcast %cst_47 : f32 to vector<8x128xf32>
    %96 = arith.addf %95, %94 : vector<8x128xf32>
    %97 = arith.mulf %91, %96 : vector<8x128xf32>
    %c0_48 = arith.constant 0 : index
    %c0_49 = arith.constant 0 : index
    %98 = vector.load %arg16[%c0_48, %c0_49] : memref<128x32xf32, #tpu.memory_space<vmem>>, vector<128x32xf32>
    %cst_50 = arith.constant dense<0.000000e+00> : vector<8x32xf32>
    %99 = tpu.matmul %97, %98, %cst_50 {dimension_numbers = #tpu.dot_dimension_numbers<[1], [0], [0], [1], [0, 0, 1, 1], [], []>} : vector<8x128xf32>, vector<128x32xf32>, vector<8x32xf32> -> vector<8x32xf32>
    %c0_51 = arith.constant 0 : index
    %c0_52 = arith.constant 0 : index
    %100 = vector.load %arg17[%c0_51, %c0_52] : memref<1x32xf32, #tpu.memory_space<vmem>>, vector<1x32xf32>
    %101 = vector.broadcast %100 : vector<1x32xf32> to vector<8x32xf32>
    %102 = arith.addf %99, %101 : vector<8x32xf32>
    %103 = arith.addf %60, %102 : vector<8x32xf32>
    %c0_53 = arith.constant 0 : index
    %c0_54 = arith.constant 0 : index
    %104 = vector.load %arg2[%c0_53, %c0_54] : memref<8x32xf32, #tpu.memory_space<vmem>>, vector<8x32xf32>
    %c0_55 = arith.constant 0 : index
    %c0_56 = arith.constant 0 : index
    %105 = vector.load %arg18[%c0_55, %c0_56] : memref<32x128xf32, #tpu.memory_space<vmem>>, vector<32x128xf32>
    %cst_57 = arith.constant dense<0.000000e+00> : vector<8x128xf32>
    %106 = tpu.matmul %103, %105, %cst_57 {dimension_numbers = #tpu.dot_dimension_numbers<[1], [0], [0], [1], [0, 0, 1, 1], [], []>} : vector<8x32xf32>, vector<32x128xf32>, vector<8x128xf32> -> vector<8x128xf32>
    %c0_58 = arith.constant 0 : index
    %c0_59 = arith.constant 0 : index
    %107 = vector.load %arg19[%c0_58, %c0_59] : memref<32x128xf32, #tpu.memory_space<vmem>>, vector<32x128xf32>
    %cst_60 = arith.constant dense<0.000000e+00> : vector<8x128xf32>
    %108 = tpu.matmul %104, %107, %cst_60 {dimension_numbers = #tpu.dot_dimension_numbers<[1], [0], [0], [1], [0, 0, 1, 1], [], []>} : vector<8x32xf32>, vector<32x128xf32>, vector<8x128xf32> -> vector<8x128xf32>
    %109 = arith.addf %106, %108 : vector<8x128xf32>
    %c0_61 = arith.constant 0 : index
    %c0_62 = arith.constant 0 : index
    %110 = vector.load %arg20[%c0_61, %c0_62] : memref<1x128xf32, #tpu.memory_space<vmem>>, vector<1x128xf32>
    %111 = vector.broadcast %110 : vector<1x128xf32> to vector<8x128xf32>
    %112 = arith.addf %109, %111 : vector<8x128xf32>
    %c0_63 = arith.constant 0 : index
    %c0_64 = arith.constant 0 : index
    %113 = vector.load %arg21[%c0_63, %c0_64] : memref<8x128xf32, #tpu.memory_space<vmem>>, vector<8x128xf32>
    tpu.vector_store %arg21[%c0_63, %c0_64], %112 {strides = array<i32>} : memref<8x128xf32, #tpu.memory_space<vmem>>, vector<8x128xf32>,
    return
  }
  func.func @transform_0(%arg0: i32) -> (i32, i32, i32) {
    %c0_i32 = arith.constant 0 : i32
    %c0_i32_0 = arith.constant 0 : i32
    %c0_i32_1 = arith.constant 0 : i32
    return %arg0, %c0_i32, %c0_i32_0 : i32, i32, i32
  }
  func.func @transform_1(%arg0: i32) -> (i32, i32) {
    %c0_i32 = arith.constant 0 : i32
    %c0_i32_0 = arith.constant 0 : i32
    return %arg0, %c0_i32 : i32, i32
  }
  func.func @transform_2(%arg0: i32) -> (i32, i32) {
    %c0_i32 = arith.constant 0 : i32
    %c0_i32_0 = arith.constant 0 : i32
    %c0_i32_1 = arith.constant 0 : i32
    return %c0_i32, %c0_i32_0 : i32, i32
  }
  func.func @transform_3(%arg0: i32) -> (i32, i32) {
    %c0_i32 = arith.constant 0 : i32
    %c0_i32_0 = arith.constant 0 : i32
    %c0_i32_1 = arith.constant 0 : i32
    return %c0_i32, %c0_i32_0 : i32, i32
  }
  func.func @transform_4(%arg0: i32) -> (i32, i32) {
    %c0_i32 = arith.constant 0 : i32
    %c0_i32_0 = arith.constant 0 : i32
    %c0_i32_1 = arith.constant 0 : i32
    return %c0_i32, %c0_i32_0 : i32, i32
  }
  func.func @transform_5(%arg0: i32) -> (i32, i32) {
    %c0_i32 = arith.constant 0 : i32
    %c0_i32_0 = arith.constant 0 : i32
    %c0_i32_1 = arith.constant 0 : i32
    return %c0_i32, %c0_i32_0 : i32, i32
  }
  func.func @transform_6(%arg0: i32) -> (i32, i32) {
    %c0_i32 = arith.constant 0 : i32
    %c0_i32_0 = arith.constant 0 : i32
    %c0_i32_1 = arith.constant 0 : i32
    return %c0_i32, %c0_i32_0 : i32, i32
  }
  func.func @transform_7(%arg0: i32) -> (i32, i32) {
    %c0_i32 = arith.constant 0 : i32
    %c0_i32_0 = arith.constant 0 : i32
    %c0_i32_1 = arith.constant 0 : i32
    return %c0_i32, %c0_i32_0 : i32, i32
  }
  func.func @transform_8(%arg0: i32) -> (i32, i32) {
    %c0_i32 = arith.constant 0 : i32
    %c0_i32_0 = arith.constant 0 : i32
    %c0_i32_1 = arith.constant 0 : i32
    return %c0_i32, %c0_i32_0 : i32, i32
  }
  func.func @transform_9(%arg0: i32) -> (i32, i32) {
    %c0_i32 = arith.constant 0 : i32
    %c0_i32_0 = arith.constant 0 : i32
    %c0_i32_1 = arith.constant 0 : i32
    return %c0_i32, %c0_i32_0 : i32, i32
  }
  func.func @transform_10(%arg0: i32) -> (i32, i32) {
    %c0_i32 = arith.constant 0 : i32
    %c0_i32_0 = arith.constant 0 : i32
    %c0_i32_1 = arith.constant 0 : i32
    return %c0_i32, %c0_i32_0 : i32, i32
  }
  func.func @transform_11(%arg0: i32) -> (i32, i32) {
    %c0_i32 = arith.constant 0 : i32
    %c0_i32_0 = arith.constant 0 : i32
    %c0_i32_1 = arith.constant 0 : i32
    return %c0_i32, %c0_i32_0 : i32, i32
  }
  func.func @transform_12(%arg0: i32) -> (i32, i32) {
    %c0_i32 = arith.constant 0 : i32
    %c0_i32_0 = arith.constant 0 : i32
    %c0_i32_1 = arith.constant 0 : i32
    return %c0_i32, %c0_i32_0 : i32, i32
  }
  func.func @transform_13(%arg0: i32) -> (i32, i32) {
    %c0_i32 = arith.constant 0 : i32
    %c0_i32_0 = arith.constant 0 : i32
    %c0_i32_1 = arith.constant 0 : i32
    return %c0_i32, %c0_i32_0 : i32, i32
  }
  func.func @transform_14(%arg0: i32) -> (i32, i32) {
    %c0_i32 = arith.constant 0 : i32
    %c0_i32_0 = arith.constant 0 : i32
    %c0_i32_1 = arith.constant 0 : i32
    return %c0_i32, %c0_i32_0 : i32, i32
  }
  func.func @transform_15(%arg0: i32) -> (i32, i32) {
    %c0_i32 = arith.constant 0 : i32
    %c0_i32_0 = arith.constant 0 : i32
    %c0_i32_1 = arith.constant 0 : i32
    return %c0_i32, %c0_i32_0 : i32, i32
  }
  func.func @transform_16(%arg0: i32) -> (i32, i32) {
    %c0_i32 = arith.constant 0 : i32
    %c0_i32_0 = arith.constant 0 : i32
    %c0_i32_1 = arith.constant 0 : i32
    return %c0_i32, %c0_i32_0 : i32, i32
  }
  func.func @transform_17(%arg0: i32) -> (i32, i32) {
    %c0_i32 = arith.constant 0 : i32
    %c0_i32_0 = arith.constant 0 : i32
    %c0_i32_1 = arith.constant 0 : i32
    return %c0_i32, %c0_i32_0 : i32, i32
  }
  func.func @transform_18(%arg0: i32) -> (i32, i32) {
    %c0_i32 = arith.constant 0 : i32
    %c0_i32_0 = arith.constant 0 : i32
    %c0_i32_1 = arith.constant 0 : i32
    return %c0_i32, %c0_i32_0 : i32, i32
  }
  func.func @transform_19(%arg0: i32) -> (i32, i32) {
    %c0_i32 = arith.constant 0 : i32
    %c0_i32_0 = arith.constant 0 : i32
    %c0_i32_1 = arith.constant 0 : i32
    return %c0_i32, %c0_i32_0 : i32, i32
  }
  func.func @transform_20(%arg0: i32) -> (i32, i32) {
    %c0_i32 = arith.constant 0 : i32
    %c0_i32_0 = arith.constant 0 : i32
    return %arg0, %c0_i32 : i32, i32
  }
}

</mosaic_0001>

<bundles_post_ra>
// kernel: tpu_custom_call.1
= control target key start
LH: loop header
LB: loop body
LE: loop exit
PB: predicated region body
PF: predicated region fallthrough
CT: control target
= control target key end

     0   :  { %s2727_s0 = inlined_call_operand.vmem [shape: f32[8,8,32], index: 0, kind: input, shape index: {}]   ;;  %s2728_s1 = inlined_call_operand.hbm [shape: f32[8,32], index: 1, kind: input, shape index: {}]   ;;  %s2729_s2 = inlined_call_operand.hbm [shape: f32[1,32], index: 2, kind: input, shape index: {}]   ;;  %s2730_s3 = inlined_call_operand.vmem [shape: f32[32,4], index: 3, kind: input, shape index: {}]   ;;  %s2731_s4 = inlined_call_operand.hbm [shape: f32[4,32], index: 4, kind: input, shape index: {}]   ;;  %s2732_s5 = inlined_call_operand.hbm [shape: f32[1,32], index: 5, kind: input, shape index: {}]   ;;  %s2733_s6 = inlined_call_operand.hbm [shape: f32[1,32], index: 6, kind: input, shape index: {}]   ;;  %s2734_s7 = inlined_call_operand.vmem [shape: f32[32,64], index: 7, kind: input, shape index: {}]   ;;  %s2735_s8 = inlined_call_operand.hbm [shape: f32[1,64], index: 8, kind: input, shape index: {}]   ;;  %s2736_s9 = inlined_call_operand.vmem [shape: f32[32,32], index: 9, kind: input, shape index: {}]   ;;  %s2737_s10 = inlined_call_operand.hbm [shape: f32[1,32], index: 10, kind: input, shape index: {}]   ;;  %s2738_s11 = inlined_call_operand.hbm [shape: f32[1,32], index: 11, kind: input, shape index: {}]   ;;  %s2739_s12 = inlined_call_operand.hbm [shape: f32[1,32], index: 12, kind: input, shape index: {}]   ;;  %s2740_s13 = inlined_call_operand.vmem [shape: f32[32,128], index: 13, kind: input, shape index: {}]   ;;  %s2741_s14 = inlined_call_operand.hbm [shape: f32[1,128], index: 14, kind: input, shape index: {}]   ;;  %s2742_s15 = inlined_call_operand.vmem [shape: f32[128,32], index: 15, kind: input, shape index: {}]   ;;  %s2743_s16 = inlined_call_operand.hbm [shape: f32[1,32], index: 16, kind: input, shape index: {}]   ;;  %s2744_s17 = inlined_call_operand.vmem [shape: f32[32,128], index: 17, kind: input, shape index: {}]   ;;  %s2745_s18 = inlined_call_operand.vmem [shape: f32[32,128], index: 18, kind: input, shape index: {}]   ;;  %s2746_s19 = inlined_call_operand.vmem [shape: f32[1,128], index: 19, kind: input, shape index: {}]   ;;  %s2747_s20 = inlined_call_operand.hbm [shape: f32[8,128], index: 20, kind: output, shape index: {}]  }
   0x1   :  { %2753 = sst [smem:[#allocation28_spill]] %s2727_s0 }
   0x2   :  { %2754 = sst [smem:[#allocation29_spill]] %s2728_s1 }
   0x3   :  { %2755 = sst [smem:[#allocation30_spill]] %s2729_s2 }
   0x4   :  { %2756 = sst [smem:[#allocation31_spill]] %s2730_s3 }
   0x5   :  { %2757 = sst [smem:[#allocation32_spill]] %s2731_s4 }
   0x6   :  { %25 = vsyncpa [#allocation3], 0 }
   0x7   :  { %26 = vsyncpa [#allocation6], 0 }
   0x8   :  { %27 = vsyncpa [#allocation9], 0 }
   0x9   :  { %28 = vsyncpa [#allocation12], 0 }
   0xa   :  { %29 = vsyncpa [#allocation15], 0 }
   0xb   :  { %30 = vsyncpa [#allocation18], 0 }
   0xc   :  { %31 = vsyncpa [#allocation4], 0  ;;  %s2146_s1 = smov [#allocation5]   ;;  %s2147_s23 = smov [#allocation8]  }
   0xd   :  { %s50_s22 = sshll.u32 %s2146_s1, 4  ;;  %s72_s24 = sshll.u32 %s2147_s23, 4  ;;  %s51_s22 = int_to_ptr.vmem [resolvable:$true] %s50_s22  ;;  %s73_s24 = int_to_ptr.vmem [resolvable:$true] %s72_s24 }
   0xe   :  { %s2758_s3 = sld [smem:[#allocation30_spill]] }
  0x14   :  { %s1868_s26 = scalar_lea.hbm %s2758_s3, 16 }
  0x15   :  { %p1869_p0 = scmp.ne.s32.totalorder %s2758_s3, %s1868_s26  ;;  %p1872_p1 = scmp.lt.u32.totalorder %s1868_s26, %s2758_s3 }
  0x17   :  { %p1874_p2 = pnand %p1872_p1, %p1869_p0 }
  0x19   :  { %1877 = shalt.err (!%p1874_p2)
}
  0x1a   :  { %s1878_s30 = scalar_lea.vmem %s51_s22, 16  ;;  %s1882_s0 = scalar_lea.vmem %s51_s22, 32 }
  0x1b   :  { %p1879_p3 = scmp.ne.s32.totalorder %s51_s22, %s1878_s30  ;;  %p1883_p4 = scmp.lt.s32.totalorder %s51_s22, %s51_s22 }
  0x1c   :  { %p1884_p5 = scmp.lt.s32.totalorder %s1882_s0, %s1878_s30 }
  0x1e   :  { %p1885_p6 = por %p1884_p5, %p1883_p4 }
  0x20   :  { %p1886_p7 = pnand %p1885_p6, %p1879_p3 }
  0x22   :  { %1889 = shalt.err (!%p1886_p7)
}
  0x23   :  { %53 = dma.hbm_to_vmem [thread:$0]  %s2758_s3, 16, %s51_s22, [#allocation6]  }
  0x24   :  { %s1890_s25 = scalar_lea.hbm %s2732_s5, 16 }
  0x25   :  { %p1891_p8 = scmp.ne.s32.totalorder %s2732_s5, %s1890_s25  ;;  %p1894_p9 = scmp.lt.u32.totalorder %s1890_s25, %s2732_s5 }
  0x27   :  { %p1896_p10 = pnand %p1894_p9, %p1891_p8 }
  0x29   :  { %1899 = shalt.err (!%p1896_p10)
}
  0x2a   :  { %s1900_s29 = scalar_lea.vmem %s73_s24, 16  ;;  %s1904_s30 = scalar_lea.vmem %s73_s24, 32 }
  0x2b   :  { %p1901_p11 = scmp.ne.s32.totalorder %s73_s24, %s1900_s29  ;;  %p1905_p12 = scmp.lt.s32.totalorder %s73_s24, %s73_s24 }
  0x2c   :  { %p1906_p13 = scmp.lt.s32.totalorder %s1904_s30, %s1900_s29 }
  0x2e   :  { %p1907_p0 = por %p1906_p13, %p1905_p12 }
  0x30   :  { %p1908_p1 = pnand %p1907_p0, %p1901_p11 }
  0x32   :  { %1911 = shalt.err (!%p1908_p1)
}
  0x33   :  { %75 = dma.hbm_to_vmem [thread:$0]  %s2732_s5, 16, %s73_s24, [#allocation9]  }
  0x34   :  { %s2148_s0 = smov [#allocation11]   ;;  %s2149_s1 = smov [#allocation14]  }
  0x35   :  { %s94_s21 = sshll.u32 %s2148_s0, 4  ;;  %s116_s23 = sshll.u32 %s2149_s1, 4  ;;  %s95_s21 = int_to_ptr.vmem [resolvable:$true] %s94_s21  ;;  %s117_s23 = int_to_ptr.vmem [resolvable:$true] %s116_s23 }
  0x36   :  { %s1912_s27 = scalar_lea.hbm %s2735_s8, 16 }
  0x37   :  { %p1913_p2 = scmp.ne.s32.totalorder %s2735_s8, %s1912_s27  ;;  %p1916_p3 = scmp.lt.u32.totalorder %s1912_s27, %s2735_s8 }
  0x39   :  { %p1918_p4 = pnand %p1916_p3, %p1913_p2 }
  0x3b   :  { %1921 = shalt.err (!%p1918_p4)
}
  0x3c   :  { %s1922_s5 = scalar_lea.vmem %s95_s21, 16  ;;  %s1926_s24 = scalar_lea.vmem %s95_s21, 32 }
  0x3d   :  { %p1923_p5 = scmp.ne.s32.totalorder %s95_s21, %s1922_s5  ;;  %p1927_p6 = scmp.lt.s32.totalorder %s95_s21, %s95_s21 }
  0x3e   :  { %p1928_p7 = scmp.lt.s32.totalorder %s1926_s24, %s1922_s5 }
  0x40   :  { %p1929_p8 = por %p1928_p7, %p1927_p6 }
  0x42   :  { %p1930_p9 = pnand %p1929_p8, %p1923_p5 }
  0x44   :  { %1933 = shalt.err (!%p1930_p9)
}
  0x45   :  { %97 = dma.hbm_to_vmem [thread:$0]  %s2735_s8, 16, %s95_s21, [#allocation12]  }
  0x46   :  { %s1934_s1 = scalar_lea.hbm %s2738_s11, 16 }
  0x47   :  { %p1935_p10 = scmp.ne.s32.totalorder %s2738_s11, %s1934_s1  ;;  %p1938_p11 = scmp.lt.u32.totalorder %s1934_s1, %s2738_s11 }
  0x49   :  { %p1940_p12 = pnand %p1938_p11, %p1935_p10 }
  0x4b   :  { %1943 = shalt.err (!%p1940_p12)
}
  0x4c   :  { %s1944_s28 = scalar_lea.vmem %s117_s23, 16  ;;  %s1948_s4 = scalar_lea.vmem %s117_s23, 32 }
  0x4d   :  { %p1945_p13 = scmp.ne.s32.totalorder %s117_s23, %s1944_s28  ;;  %p1949_p0 = scmp.lt.s32.totalorder %s117_s23, %s117_s23 }
  0x4e   :  { %p1950_p1 = scmp.lt.s32.totalorder %s1948_s4, %s1944_s28 }
  0x50   :  { %p1951_p2 = por %p1950_p1, %p1949_p0 }
  0x52   :  { %p1952_p3 = pnand %p1951_p2, %p1945_p13 }
  0x54   :  { %1955 = shalt.err (!%p1952_p3)
}
  0x55   :  { %119 = dma.hbm_to_vmem [thread:$0]  %s2738_s11, 16, %s117_s23, [#allocation15]  }
  0x56   :  { %s2150_s29 = smov [#allocation17]   ;;  %s2151_s24 = smov [#allocation2]  }
  0x57   :  { %s138_s5 = sshll.u32 %s2150_s29, 4  ;;  %s40_s30 = sshll.u32 %s2151_s24, 4  ;;  %s139_s5 = int_to_ptr.vmem [resolvable:$true] %s138_s5  ;;  %s41_s30 = int_to_ptr.vmem [resolvable:$true] %s40_s30 }
  0x58   :  { %s1956_s0 = scalar_lea.hbm %s2741_s14, 16 }
  0x59   :  { %p1957_p4 = scmp.ne.s32.totalorder %s2741_s14, %s1956_s0  ;;  %p1960_p5 = scmp.lt.u32.totalorder %s1956_s0, %s2741_s14 }
  0x5b   :  { %p1962_p6 = pnand %p1960_p5, %p1957_p4 }
  0x5d   :  { %1965 = shalt.err (!%p1962_p6)
}
  0x5e   :  { %s1966_s11 = scalar_lea.vmem %s139_s5, 16  ;;  %s1970_s23 = scalar_lea.vmem %s139_s5, 32 }
  0x5f   :  { %p1967_p7 = scmp.ne.s32.totalorder %s139_s5, %s1966_s11  ;;  %p1971_p8 = scmp.lt.s32.totalorder %s139_s5, %s139_s5 }
  0x60   :  { %p1972_p9 = scmp.lt.s32.totalorder %s1970_s23, %s1966_s11 }
  0x62   :  { %p1973_p10 = por %p1972_p9, %p1971_p8 }
  0x64   :  { %p1974_p11 = pnand %p1973_p10, %p1967_p7 }
  0x66   :  { %1977 = shalt.err (!%p1974_p11)
}
  0x67   :  { %141 = dma.hbm_to_vmem [thread:$0]  %s2741_s14, 16, %s139_s5, [#allocation18]  }
  0x68   :  { %s2759_s21 = sld [smem:[#allocation29_spill]] }
  0x6e   :  { %s1978_s29 = scalar_lea.hbm %s2759_s21, 128 }
  0x6f   :  { %p1979_p12 = scmp.ne.s32.totalorder %s2759_s21, %s1978_s29  ;;  %p1982_p13 = scmp.lt.u32.totalorder %s1978_s29, %s2759_s21 }
  0x71   :  { %p1984_p0 = pnand %p1982_p13, %p1979_p12 }
  0x73   :  { %1987 = shalt.err (!%p1984_p0)
}
  0x74   :  { %s1988_s1 = scalar_lea.vmem %s41_s30, 128  ;;  %p1993_p2 = scmp.lt.s32.totalorder %s41_s30, %s41_s30 }
  0x75   :  { %p1989_p1 = scmp.ne.s32.totalorder %s41_s30, %s1988_s1  ;;  %p1994_p3 = scmp.lt.s32.totalorder %s1988_s1, %s1988_s1 }
  0x77   :  { %p1995_p4 = por %p1994_p3, %p1993_p2 }
  0x79   :  { %p1996_p5 = pnand %p1995_p4, %p1989_p1 }
  0x7b   :  { %1999 = shalt.err (!%p1996_p5)
}
  0x7c   :  { %43 = dma.hbm_to_vmem [thread:$0]  %s2759_s21, 128, %s41_s30, [#allocation3]  }
  0x7d   :  { %s2152_s2 = smov [#allocation7]   ;;  %s2153_s27 = smov [#allocation10]  }
  0x7e   :  { %s62_s25 = sshll.u32 %s2152_s2, 4  ;;  %s82_s11 = sshll.u32 %s2153_s27, 4  ;;  %s63_s25 = int_to_ptr.vmem [resolvable:$true] %s62_s25  ;;  %s83_s11 = int_to_ptr.vmem [resolvable:$true] %s82_s11 }
  0x7f   :  { %s2760_s28 = sld [smem:[#allocation32_spill]] }
  0x85   :  { %s2000_s4 = scalar_lea.hbm %s2760_s28, 64 }
  0x86   :  { %p2001_p6 = scmp.ne.s32.totalorder %s2760_s28, %s2000_s4  ;;  %p2004_p7 = scmp.lt.u32.totalorder %s2000_s4, %s2760_s28 }
  0x88   :  { %p2006_p8 = pnand %p2004_p7, %p2001_p6 }
  0x8a   :  { %2009 = shalt.err (!%p2006_p8)
}
  0x8b   :  { %s2010_s30 = scalar_lea.vmem %s63_s25, 64  ;;  %p2015_p10 = scmp.lt.s32.totalorder %s63_s25, %s63_s25 }
  0x8c   :  { %p2011_p9 = scmp.ne.s32.totalorder %s63_s25, %s2010_s30  ;;  %p2016_p11 = scmp.lt.s32.totalorder %s2010_s30, %s2010_s30 }
  0x8e   :  { %p2017_p12 = por %p2016_p11, %p2015_p10 }
  0x90   :  { %p2018_p13 = pnand %p2017_p12, %p2011_p9 }
  0x92   :  { %2021 = shalt.err (!%p2018_p13)
}
  0x93   :  { %65 = dma.hbm_to_vmem [thread:$0]  %s2760_s28, 64, %s63_s25, [#allocation6]  }
  0x94   :  { %s2022_s14 = scalar_lea.hbm %s2733_s6, 16 }
  0x95   :  { %p2023_p0 = scmp.ne.s32.totalorder %s2733_s6, %s2022_s14  ;;  %p2026_p1 = scmp.lt.u32.totalorder %s2022_s14, %s2733_s6 }
  0x97   :  { %p2028_p2 = pnand %p2026_p1, %p2023_p0 }
  0x99   :  { %2031 = shalt.err (!%p2028_p2)
}
  0x9a   :  { %s2032_s26 = scalar_lea.vmem %s83_s11, 16  ;;  %s2036_s4 = scalar_lea.vmem %s83_s11, 32 }
  0x9b   :  { %p2033_p3 = scmp.ne.s32.totalorder %s83_s11, %s2032_s26  ;;  %p2037_p4 = scmp.lt.s32.totalorder %s83_s11, %s83_s11 }
  0x9c   :  { %p2038_p5 = scmp.lt.s32.totalorder %s2036_s4, %s2032_s26 }
  0x9e   :  { %p2039_p6 = por %p2038_p5, %p2037_p4 }
  0xa0   :  { %p2040_p7 = pnand %p2039_p6, %p2033_p3 }
  0xa2   :  { %2043 = shalt.err (!%p2040_p7)
}
  0xa3   :  { %85 = dma.hbm_to_vmem [thread:$0]  %s2733_s6, 16, %s83_s11, [#allocation9]  }
  0xa4   :  { %s2154_s8 = smov [#allocation13]   ;;  %s2155_s24 = smov [#allocation16]  }
  0xa5   :  { %s106_s29 = sshll.u32 %s2154_s8, 4  ;;  %s126_s22 = sshll.u32 %s2155_s24, 4  ;;  %s107_s29 = int_to_ptr.vmem [resolvable:$true] %s106_s29  ;;  %s127_s22 = int_to_ptr.vmem [resolvable:$true] %s126_s22 }
  0xa6   :  { %s2044_s3 = scalar_lea.hbm %s2737_s10, 16 }
  0xa7   :  { %p2045_p8 = scmp.ne.s32.totalorder %s2737_s10, %s2044_s3  ;;  %p2048_p9 = scmp.lt.u32.totalorder %s2044_s3, %s2737_s10 }
  0xa9   :  { %p2050_p10 = pnand %p2048_p9, %p2045_p8 }
  0xab   :  { %2053 = shalt.err (!%p2050_p10)
}
  0xac   :  { %s2054_s6 = scalar_lea.vmem %s107_s29, 16  ;;  %s2058_s11 = scalar_lea.vmem %s107_s29, 32 }
  0xad   :  { %p2055_p11 = scmp.ne.s32.totalorder %s107_s29, %s2054_s6  ;;  %p2059_p12 = scmp.lt.s32.totalorder %s107_s29, %s107_s29 }
  0xae   :  { %p2060_p13 = scmp.lt.s32.totalorder %s2058_s11, %s2054_s6 }
  0xb0   :  { %p2061_p0 = por %p2060_p13, %p2059_p12 }
  0xb2   :  { %p2062_p1 = pnand %p2061_p0, %p2055_p11 }
  0xb4   :  { %2065 = shalt.err (!%p2062_p1)
}
  0xb5   :  { %109 = dma.hbm_to_vmem [thread:$0]  %s2737_s10, 16, %s107_s29, [#allocation12]  }
  0xb6   :  { %s2066_s4 = scalar_lea.hbm %s2739_s12, 16 }
  0xb7   :  { %p2067_p2 = scmp.ne.s32.totalorder %s2739_s12, %s2066_s4  ;;  %p2070_p3 = scmp.lt.u32.totalorder %s2066_s4, %s2739_s12 }
  0xb9   :  { %p2072_p4 = pnand %p2070_p3, %p2067_p2 }
  0xbb   :  { %2075 = shalt.err (!%p2072_p4)
}
  0xbc   :  { %s2076_s30 = scalar_lea.vmem %s127_s22, 16  ;;  %s2080_s21 = scalar_lea.vmem %s127_s22, 32 }
  0xbd   :  { %p2077_p5 = scmp.ne.s32.totalorder %s127_s22, %s2076_s30  ;;  %p2081_p6 = scmp.lt.s32.totalorder %s127_s22, %s127_s22 }
  0xbe   :  { %p2082_p7 = scmp.lt.s32.totalorder %s2080_s21, %s2076_s30 }
  0xc0   :  { %p2083_p8 = por %p2082_p7, %p2081_p6 }
  0xc2   :  { %p2084_p9 = pnand %p2083_p8, %p2077_p5 }
  0xc4   :  { %2087 = shalt.err (!%p2084_p9)
}
  0xc5   :  { %129 = dma.hbm_to_vmem [thread:$0]  %s2739_s12, 16, %s127_s22, [#allocation15]  }
  0xc6   :  { %s2156_s3 = smov [#allocation19]   ;;  %s2088_s5 = scalar_lea.hbm %s2743_s16, 16 }
  0xc7   :  { %s150_s0 = sshll.u32 %s2156_s3, 4  ;;  %p2089_p10 = scmp.ne.s32.totalorder %s2743_s16, %s2088_s5  ;;  %s151_s0 = int_to_ptr.vmem [resolvable:$true] %s150_s0 }
  0xc8   :  { %p2092_p11 = scmp.lt.u32.totalorder %s2088_s5, %s2743_s16 }
  0xca   :  { %p2094_p12 = pnand %p2092_p11, %p2089_p10 }
  0xcc   :  { %2097 = shalt.err (!%p2094_p12)
}
  0xcd   :  { %s2098_s23 = scalar_lea.vmem %s151_s0, 16  ;;  %s2102_s12 = scalar_lea.vmem %s151_s0, 32 }
  0xce   :  { %p2099_p13 = scmp.ne.s32.totalorder %s151_s0, %s2098_s23  ;;  %p2103_p0 = scmp.lt.s32.totalorder %s151_s0, %s151_s0 }
  0xcf   :  { %p2104_p1 = scmp.lt.s32.totalorder %s2102_s12, %s2098_s23 }
  0xd1   :  { %p2105_p2 = por %p2104_p1, %p2103_p0 }
  0xd3   :  { %p2106_p3 = pnand %p2105_p2, %p2099_p13 }
  0xd5   :  { %2109 = shalt.err (!%p2106_p3)
}
  0xd6   :  { %153 = dma.hbm_to_vmem [thread:$0]  %s2743_s16, 16, %s151_s0, [#allocation18]  }
  0xd7   :  { %2132 = dma.done.wait [#allocation3], 128  }
  0xd8   :  { %2133 = vsyncadd [#allocation3], 4294967168 }
  0xd9   :  { %2134 = dma.done.wait [#allocation6], 80  }
  0xda   :  { %2135 = vsyncadd [#allocation6], 4294967216 }
  0xdb   :  { %2136 = dma.done.wait [#allocation9], 32  }
  0xdc   :  { %2137 = vsyncadd [#allocation9], 4294967264 }
  0xdd   :  { %2138 = dma.done.wait [#allocation12], 32  }
  0xde   :  { %2139 = vsyncadd [#allocation12], 4294967264 }
  0xdf   :  { %2140 = dma.done.wait [#allocation15], 32  }
  0xe0   :  { %2141 = vsyncadd [#allocation15], 4294967264 }
  0xe1   :  { %2142 = dma.done.wait [#allocation18], 32  }
  0xe2   :  { %2143 = vsyncadd [#allocation18], 4294967264  ;;  %vm201_vm0 = vcmask 261120   ;;  %s2761_s28 = sld [smem:[#allocation28_spill]]  ;;  %v337_v56 = vld [vmem:[%s2734_s7] sm:$0xff]  ;;  %v338_v57 = vld [vmem:[%s2734_s7 + $0x8] sm:$0xff] }
  0xe3   :  { %v1736_v58 = vpack.c.bf16 %v338_v57, %v337_v56  ;;  %v339_v59 = vld [vmem:[%s2734_s7 + $0x10] sm:$0xff]  ;;  %v340_v60 = vld [vmem:[%s2734_s7 + $0x18] sm:$0xff]  ;;  %s2762_s24 = sld [smem:[#allocation31_spill]]  ;;  %s2157_s3 = smov 96   ;;  %vm788_vm1 = vcmask 1043456   ;;  %vm610_vm2 = vcmask 31744  }
  0xe4   :  { %v1740_v61 = vpack.c.bf16 %v340_v60, %v339_v59  ;;  %vm2159_vm3 = vmmov 0   ;;  %vm1004_vm4 = vcmask 1041409   ;;  %vm1006_vm5 = vcmask 1042434   ;;  %s2161_s26 = smov [#allocation20]  }
  0xe5   :  { %1737 = vmatprep.subr.bf16.mxu0 %v1736_v58  ;;  %vm1008_vm6 = vcmask 1043459   ;;  %vm1010_vm7 = vcmask 1044484   ;;  %vm1012_vm8 = vcmask 1045509   ;;  %vm1014_vm9 = vcmask 1046534   ;;  %s1480_s4 = sshll.u32 %s2161_s26, 4  ;;  %s1481_s4 = int_to_ptr.vmem [resolvable:$true] %s1480_s4 }
  0xe6   :  { %1739 = vmatpush3.bf16.msra.mxu0 %v1736_v58  ;;  %vm1016_vm10 = vcmask 1047559   ;;  %p2115_p5 = scmp.lt.s32.totalorder %s1481_s4, %s1481_s4 }
  0xe7   :  { %1741 = vmatprep.subr.bf16.mxu0 %v1740_v61 }
  0xe8   :  { %v193_v0 = vld [vmem:[%s2761_s28] sm:$0xff]  ;;  %v195_v1 = vld [vmem:[%s2761_s28 + $0x10] sm:$0xff]  ;;  %v194_v2 = vld [vmem:[%s2761_s28 + $0x8] sm:$0xff] }
  0xe9   :  { %v202_v3 = vsel %vm201_vm0, %v193_v0, 0.0  ;;  %v208_v4 = vsel %vm201_vm0, %v195_v1, 0.0  ;;  %v196_v5 = vld [vmem:[%s2761_s28 + $0x18] sm:$0xff]  ;;  %v205_v6 = vsel %vm201_vm0, %v194_v2, 0.0  ;;  %v197_v8 = vld [vmem:[%s2761_s28 + $0x20] sm:$0xff]  ;;  %v198_v9 = vld [vmem:[%s2761_s28 + $0x28] sm:$0xff] }
  0xea   :  { %203 = vadd.xlane.f32.xlu0 %v202_v3  ;;  %209 = vadd.xlane.f32.xlu1 %v208_v4  ;;  %v211_v7 = vsel %vm201_vm0, %v196_v5, 0.0  ;;  %v214_v10 = vsel %vm201_vm0, %v197_v8, 0.0  ;;  %v217_v11 = vsel %vm201_vm0, %v198_v9, 0.0  ;;  %v199_v12 = vld [vmem:[%s2761_s28 + $0x30] sm:$0xff]  ;;  %v200_v13 = vld [vmem:[%s2761_s28 + $0x38] sm:$0xff]  ;;  %v477_v62 = vld [vmem:[%s2762_s24] sm:$0xff] }
  0xeb   :  { %v220_v14 = vsel %vm201_vm0, %v199_v12, 0.0  ;;  %v223_v15 = vsel %vm201_vm0, %v200_v13, 0.0  ;;  %1743 = vmatpush3.bf16.msra.mxu0 %v1740_v61  ;;  %v478_v63 = vld [vmem:[%s2762_s24 + $0x8] sm:$0xff]  ;;  %v480_v61 = vld [vmem:[%s2762_s24 + $0x18] sm:$0xff] }
  0xee   :  { %206 = vadd.xlane.f32.xlu0 %v205_v6  ;;  %212 = vadd.xlane.f32.xlu1 %v211_v7 }
  0xf2   :  { %215 = vadd.xlane.f32.xlu0 %v214_v10  ;;  %218 = vadd.xlane.f32.xlu1 %v217_v11 }
  0xf6   :  { %221 = vadd.xlane.f32.xlu0 %v220_v14  ;;  %224 = vadd.xlane.f32.xlu1 %v223_v15 }
 0x177   :  { %v204_v16 = vpop.xlane.xlu0 %203  ;;  %v210_v17 = vpop.xlane.xlu1 %209 }
 0x178   :  { %v227_v18 = vmul.f32 0.03125, %v204_v16  ;;  %v229_v19 = vmul.f32 0.03125, %v210_v17 }
 0x17a   :  { %v2431_v20 = vsub.f32 %v193_v0, %v227_v18  ;;  %v2433_v21 = vsub.f32 %v195_v1, %v229_v19  ;;  %v1744_v0 = vpack.c.bf16 %v478_v63, %v477_v62 }
 0x17b   :  { %v207_v22 = vpop.xlane.xlu0 %206  ;;  %v213_v23 = vpop.xlane.xlu1 %212 }
 0x17c   :  { %v228_v24 = vmul.f32 0.03125, %v207_v22  ;;  %v230_v25 = vmul.f32 0.03125, %v213_v23  ;;  %v243_v26 = vmul.f32 %v2431_v20, %v2431_v20  ;;  %v245_v27 = vmul.f32 %v2433_v21, %v2433_v21  ;;  %1745 = vmatprep.subr.bf16.mxu1 %v1744_v0 }
 0x17d   :  { %1747 = vmatpush3.bf16.msra.mxu1 %v1744_v0 }
 0x17e   :  { %v2439_v28 = vsub.f32 %v194_v2, %v228_v24  ;;  %v2441_v29 = vsub.f32 %v196_v5, %v230_v25  ;;  %v251_v30 = vsel %vm201_vm0, %v243_v26, 0.0  ;;  %v257_v33 = vsel %vm201_vm0, %v245_v27, 0.0  ;;  %v1494_v25 = vld [vmem:[#allocation8] ss:$0 sm:$0xff] }
 0x17f   :  { %252 = vadd.xlane.f32.xlu0 %v251_v30  ;;  %v216_v31 = vpop.xlane.xlu0 %215  ;;  %v219_v32 = vpop.xlane.xlu1 %218 }
 0x180   :  { %v231_v34 = vmul.f32 0.03125, %v216_v31  ;;  %v232_v35 = vmul.f32 0.03125, %v219_v32  ;;  %v244_v36 = vmul.f32 %v2439_v28, %v2439_v28  ;;  %v246_v37 = vmul.f32 %v2441_v29, %v2441_v29  ;;  %v1495_v31 = vld [vmem:[#allocation10] ss:$0 sm:$0xff] }
 0x182   :  { %v2449_v38 = vsub.f32 %v197_v8, %v231_v34  ;;  %v2451_v39 = vsub.f32 %v198_v9, %v232_v35  ;;  %v254_v40 = vsel %vm201_vm0, %v244_v36, 0.0  ;;  %v260_v43 = vsel %vm201_vm0, %v246_v37, 0.0 }
 0x183   :  { %258 = vadd.xlane.f32.xlu0 %v257_v33  ;;  %255 = vadd.xlane.f32.xlu1 %v254_v40  ;;  %v222_v41 = vpop.xlane.xlu0 %221  ;;  %v225_v42 = vpop.xlane.xlu1 %224 }
 0x184   :  { %v233_v44 = vmul.f32 0.03125, %v222_v41  ;;  %v234_v45 = vmul.f32 0.03125, %v225_v42  ;;  %v247_v46 = vmul.f32 %v2449_v38, %v2449_v38  ;;  %v248_v47 = vmul.f32 %v2451_v39, %v2451_v39 }
 0x186   :  { %v2459_v48 = vsub.f32 %v199_v12, %v233_v44  ;;  %v2461_v49 = vsub.f32 %v200_v13, %v234_v45  ;;  %v263_v50 = vsel %vm201_vm0, %v247_v46, 0.0  ;;  %v266_v51 = vsel %vm201_vm0, %v248_v47, 0.0 }
 0x187   :  { %261 = vadd.xlane.f32.xlu1 %v260_v43  ;;  %264 = vadd.xlane.f32.xlu0 %v263_v50 }
 0x188   :  { %v249_v52 = vmul.f32 %v2459_v48, %v2459_v48  ;;  %v250_v53 = vmul.f32 %v2461_v49, %v2461_v49 }
 0x18a   :  { %v269_v54 = vsel %vm201_vm0, %v249_v52, 0.0  ;;  %v272_v55 = vsel %vm201_vm0, %v250_v53, 0.0 }
 0x18b   :  { %267 = vadd.xlane.f32.xlu1 %v266_v51  ;;  %270 = vadd.xlane.f32.xlu0 %v269_v54 }
 0x18f   :  { %273 = vadd.xlane.f32.xlu1 %v272_v55 }
 0x20c   :  { %v253_v1 = vpop.xlane.xlu0 %252 }
 0x20d   :  { %v275_v2 = vmul.f32 0.03125, %v253_v1 }
 0x20f   :  { %v283_v3 = vadd.f32 1e-05, %v275_v2 }
 0x210   :  { %v256_v4 = vpop.xlane.xlu1 %255  ;;  %v259_v5 = vpop.xlane.xlu0 %258 }
 0x211   :  { %1816 = vrsqrt.f32 %v283_v3  ;;  %v276_v6 = vmul.f32 0.03125, %v256_v4  ;;  %v277_v7 = vmul.f32 0.03125, %v259_v5 }
 0x213   :  { %v284_v8 = vadd.f32 1e-05, %v276_v6  ;;  %v285_v9 = vadd.f32 1e-05, %v277_v7 }
 0x214   :  { %v262_v10 = vpop.xlane.xlu1 %261  ;;  %v265_v11 = vpop.xlane.xlu0 %264 }
 0x215   :  { %1818 = vrsqrt.f32 %v284_v8  ;;  %v278_v12 = vmul.f32 0.03125, %v262_v10  ;;  %v279_v13 = vmul.f32 0.03125, %v265_v11 }
 0x216   :  { %1820 = vrsqrt.f32 %v285_v9 }
 0x217   :  { %v286_v14 = vadd.f32 1e-05, %v278_v12  ;;  %v287_v15 = vadd.f32 1e-05, %v279_v13 }
 0x218   :  { %v268_v16 = vpop.xlane.xlu1 %267  ;;  %v271_v17 = vpop.xlane.xlu0 %270 }
 0x219   :  { %1822 = vrsqrt.f32 %v286_v14  ;;  %v280_v18 = vmul.f32 0.03125, %v268_v16  ;;  %v281_v19 = vmul.f32 0.03125, %v271_v17 }
 0x21a   :  { %1824 = vrsqrt.f32 %v287_v15  ;;  %v763_v15 = vld [vmem:[#allocation7] sm:$0xf] }
 0x21b   :  { %v1817_v22 = vpop.eup %1816  ;;  %v288_v23 = vadd.f32 1e-05, %v280_v18  ;;  %v289_v24 = vadd.f32 1e-05, %v281_v19  ;;  %1643 = vmatprep.subr.msk.mxu0 %vm788_vm1, %v763_v15 }
 0x21c   :  { %v274_v26 = vpop.xlane.xlu1 %273  ;;  %v299_v27 = vmul.f32 %v1817_v22, %v2431_v20 }
 0x21d   :  { %1826 = vrsqrt.f32 %v288_v23  ;;  %v282_v30 = vmul.f32 0.03125, %v274_v26 }
 0x21e   :  { %1828 = vrsqrt.f32 %v289_v24  ;;  %v314_v32 = vmul.f32 %v1494_v25, %v299_v27 }
 0x21f   :  { %v1819_v33 = vpop.eup %1818  ;;  %v290_v34 = vadd.f32 1e-05, %v282_v30 }
 0x220   :  { %v1821_v35 = vpop.eup %1820  ;;  %v329_v36 = vadd.f32 %v1495_v31, %v314_v32  ;;  %v300_v37 = vmul.f32 %v1819_v33, %v2439_v28 }
 0x221   :  { %1830 = vrsqrt.f32 %v290_v34  ;;  %v301_v40 = vmul.f32 %v1821_v35, %v2433_v21 }
 0x222   :  { %1611 = vmatprep.mubr.msk.f32.mxu0 %vm201_vm0, %v329_v36  ;;  %v315_v41 = vmul.f32 %v1494_v25, %v300_v37 }
 0x223   :  { %v1823_v42 = vpop.eup %1822  ;;  %v316_v43 = vmul.f32 %v1494_v25, %v301_v40 }
 0x224   :  { %v1825_v20 = vpop.eup %1824  ;;  %v330_v44 = vadd.f32 %v1495_v31, %v315_v41  ;;  %v302_v45 = vmul.f32 %v1823_v42, %v2441_v29 }
 0x225   :  { %v331_v46 = vadd.f32 %v1495_v31, %v316_v43  ;;  %v303_v47 = vmul.f32 %v1825_v20, %v2449_v38 }
 0x226   :  { %1612 = vmatmul.mubr.msk.f32.vlgmr.msra.gmra.mrb[0].mxu0 %vm201_vm0, %v330_v44  ;;  %v317_v50 = vmul.f32 %v1494_v25, %v302_v45 }
 0x227   :  { %v1827_v51 = vpop.eup %1826  ;;  %1614 = vmatprep.mubr.msk.f32.mxu0 %vm201_vm0, %v331_v46  ;;  %v318_v28 = vmul.f32 %v1494_v25, %v303_v47  ;;  %1644 = vmatpush3.msk.msra.mxu0 %vm788_vm1, %v763_v15 }
 0x228   :  { %v1829_v21 = vpop.eup %1828  ;;  %v332_v52 = vadd.f32 %v1495_v31, %v317_v50  ;;  %v304_v53 = vmul.f32 %v1827_v51, %v2451_v39 }
 0x229   :  { %v333_v54 = vadd.f32 %v1495_v31, %v318_v28  ;;  %v305_v55 = vmul.f32 %v1829_v21, %v2459_v48  ;;  %v479_v48 = vld [vmem:[%s2762_s24 + $0x10] sm:$0xff] }
 0x22a   :  { %1615 = vmatmul.mubr.msk.f32.gmra.mrb[2].mxu0 %vm201_vm0, %v332_v52  ;;  %v319_v29 = vmul.f32 %v1494_v25, %v304_v53  ;;  %v1748_v62 = vpack.c.bf16 %v480_v61, %v479_v48 }
 0x22b   :  { %v1831_v56 = vpop.eup %1830  ;;  %1617 = vmatprep.mubr.msk.f32.mxu0 %vm201_vm0, %v333_v54  ;;  %v320_v38 = vmul.f32 %v1494_v25, %v305_v55 }
 0x22c   :  { %v334_v57 = vadd.f32 %v1495_v31, %v319_v29  ;;  %v306_v58 = vmul.f32 %v1831_v56, %v2461_v49  ;;  %1749 = vmatprep.subr.bf16.mxu1 %v1748_v62  ;;  %v1496_v49 = vld [vmem:[#allocation11] ss:$0 sm:$0xff] }
 0x22d   :  { %v335_v59 = vadd.f32 %v1495_v31, %v320_v38  ;;  %1751 = vmatpush3.bf16.msra.mxu1 %v1748_v62 }
 0x22e   :  { %1618 = vmatmul.mubr.msk.f32.gmra.mrb[4].mxu0 %vm201_vm0, %v334_v57  ;;  %v321_v60 = vmul.f32 %v1494_v25, %v306_v58 }
 0x22f   :  { %1620 = vmatprep.mubr.msk.f32.mxu0 %vm201_vm0, %v335_v59 }
 0x230   :  { %v336_v39 = vadd.f32 %v1495_v31, %v321_v60 }
 0x232   :  { %1621 = vmatmul.mubr.msk.f32.gmra.mrb[6].mxu0 %vm201_vm0, %v336_v39 }
 0x2f9   :  { %v1613_v63 = vpop.f32.mrb[0].mxu0 }
 0x2fa   :  { %v444_v0 = vadd.f32 %v1613_v63, %v1496_v49  ;;  %v438_v1 = vpop.f32.mrb[1].mxu0 }
 0x2fb   :  { %v439_v2 = vadd.f32 %v1496_v49, %v438_v1 }
 0x2fc   :  { %899 = vrot.lane.b32.xlu1 %v444_v0, %s2157_s3 }
 0x2fd   :  { %897 = vrot.lane.b32.xlu0 %v439_v2, %s2157_s3  ;;  %v1616_v3 = vpop.f32.mrb[2].mxu0  ;;  %1631 = vmatprep.mubr.msk.f32.mxu1 %vm201_vm0, %v439_v2 }
 0x2fe   :  { %v454_v4 = vadd.f32 %v1616_v3, %v1496_v49  ;;  %v448_v5 = vpop.f32.mrb[3].mxu0  ;;  %1632 = vmatmul.mubr.msk.f32.vlgmr.msra.gmra.mrb[0].mxu1 %vm201_vm0, %v444_v0 }
 0x2ff   :  { %v449_v6 = vadd.f32 %v1496_v49, %v448_v5 }
 0x300   :  { %903 = vrot.lane.b32.xlu1 %v454_v4, %s2157_s3 }
 0x301   :  { %v1619_v7 = vpop.f32.mrb[4].mxu0  ;;  %1634 = vmatprep.mubr.msk.f32.mxu1 %vm201_vm0, %v449_v6 }
 0x302   :  { %v458_v8 = vpop.f32.mrb[5].mxu0  ;;  %1635 = vmatmul.mubr.msk.f32.gmra.mrb[2].mxu1 %vm201_vm0, %v454_v4  ;;  %v464_v10 = vadd.f32 %v1619_v7, %v1496_v49 }
 0x303   :  { %v459_v9 = vadd.f32 %v1496_v49, %v458_v8 }
 0x304   :  { %901 = vrot.lane.b32.xlu1 %v449_v6, %s2157_s3 }
 0x305   :  { %905 = vrot.lane.b32.xlu0 %v459_v9, %s2157_s3  ;;  %v1622_v11 = vpop.f32.mrb[6].mxu0  ;;  %1637 = vmatprep.mubr.msk.f32.mxu1 %vm201_vm0, %v459_v9 }
 0x306   :  { %v468_v12 = vpop.f32.mrb[7].mxu0  ;;  %1638 = vmatmul.mubr.msk.f32.gmra.mrb[4].mxu1 %vm201_vm0, %v464_v10  ;;  %v474_v14 = vadd.f32 %v1622_v11, %v1496_v49 }
 0x307   :  { %v469_v13 = vadd.f32 %v1496_v49, %v468_v12 }
 0x308   :  { %907 = vrot.lane.b32.xlu1 %v464_v10, %s2157_s3 }
 0x309   :  { %909 = vrot.lane.b32.xlu0 %v469_v13, %s2157_s3  ;;  %1640 = vmatprep.mubr.msk.f32.mxu1 %vm201_vm0, %v469_v13 }
 0x30a   :  { %1641 = vmatmul.mubr.msk.f32.gmra.mrb[6].mxu1 %vm201_vm0, %v474_v14 }
 0x30c   :  { %911 = vrot.lane.b32.xlu1 %v474_v14, %s2157_s3 }
 0x3d1   :  { %v1633_v16 = vpop.f32.mrb[0].mxu1 }
 0x3d2   :  { %v618_v17 = vsel %vm610_vm2, %v1633_v16, -inf  ;;  %v571_v18 = vpop.f32.mrb[1].mxu1 }
 0x3d3   :  { %v619_v19 = vrot.slane %v618_v17, 4  ;;  %v611_v22 = vsel %vm610_vm2, %v571_v18, -inf }
 0x3d4   :  { %v612_v23 = vrot.slane %v611_v22, 4 }
 0x3d5   :  { %v620_v24 = vmax.f32 %v618_v17, %v619_v19  ;;  %v1636_v25 = vpop.f32.mrb[2].mxu1 }
 0x3d6   :  { %v613_v26 = vmax.f32 %v611_v22, %v612_v23  ;;  %v632_v27 = vsel %vm610_vm2, %v1636_v25, -inf  ;;  %v581_v30 = vpop.f32.mrb[3].mxu1 }
 0x3d7   :  { %v621_v31 = vrot.slane %v620_v24, 2  ;;  %v633_v32 = vrot.slane %v632_v27, 4  ;;  %v625_v33 = vsel %vm610_vm2, %v581_v30, -inf }
 0x3d8   :  { %v614_v34 = vrot.slane %v613_v26, 2  ;;  %v626_v35 = vrot.slane %v625_v33, 4 }
 0x3d9   :  { %v622_v36 = vmax.f32 %v620_v24, %v621_v31  ;;  %v634_v37 = vmax.f32 %v632_v27, %v633_v32  ;;  %v1639_v40 = vpop.f32.mrb[4].mxu1 }
 0x3da   :  { %v615_v41 = vmax.f32 %v613_v26, %v614_v34  ;;  %v627_v42 = vmax.f32 %v625_v33, %v626_v35  ;;  %v646_v43 = vsel %vm610_vm2, %v1639_v40, -inf  ;;  %v591_v20 = vpop.f32.mrb[5].mxu1 }
 0x3db   :  { %v623_v44 = vrot.slane %v622_v36, 1  ;;  %v635_v45 = vrot.slane %v634_v37, 2  ;;  %v647_v46 = vrot.slane %v646_v43, 4  ;;  %v639_v47 = vsel %vm610_vm2, %v591_v20, -inf }
 0x3dc   :  { %v616_v50 = vrot.slane %v615_v41, 1  ;;  %v628_v51 = vrot.slane %v627_v42, 2  ;;  %v640_v28 = vrot.slane %v639_v47, 4 }
 0x3dd   :  { %v624_v21 = vmax.f32 %v622_v36, %v623_v44  ;;  %v636_v52 = vmax.f32 %v634_v37, %v635_v45  ;;  %v648_v53 = vmax.f32 %v646_v43, %v647_v46  ;;  %v1642_v54 = vpop.f32.mrb[6].mxu1 }
 0x3de   :  { %v617_v55 = vmax.f32 %v615_v41, %v616_v50  ;;  %v629_v29 = vmax.f32 %v627_v42, %v628_v51  ;;  %v641_v56 = vmax.f32 %v639_v47, %v640_v28  ;;  %v660_v38 = vsel %vm610_vm2, %v1642_v54, -inf  ;;  %v601_v57 = vpop.f32.mrb[7].mxu1 }
 0x3df   :  { %v668_v58 = vsub.f32 %v1633_v16, %v624_v21  ;;  %v637_v59 = vrot.slane %v636_v52, 1  ;;  %v649_v60 = vrot.slane %v648_v53, 2  ;;  %v661_v39 = vrot.slane %v660_v38, 4 }
 0x3e0   :  { %v667_v48 = vsub.f32 %v571_v18, %v617_v55  ;;  %v630_v61 = vrot.slane %v629_v29, 1  ;;  %v642_v62 = vrot.slane %v641_v56, 2  ;;  %v653_v49 = vsel %vm610_vm2, %v601_v57, -inf }
 0x3e1   :  { %v677_v63 = vmul.f32 1.442695, %v668_v58  ;;  %v638_v0 = vmax.f32 %v636_v52, %v637_v59  ;;  %v650_v1 = vmax.f32 %v648_v53, %v649_v60  ;;  %v662_v2 = vmax.f32 %v660_v38, %v661_v39 }
 0x3e2   :  { %v675_v3 = vmul.f32 1.442695, %v667_v48  ;;  %v631_v4 = vmax.f32 %v629_v29, %v630_v61  ;;  %v643_v5 = vmax.f32 %v641_v56, %v642_v62  ;;  %v654_v6 = vrot.slane %v653_v49, 4 }
 0x3e3   :  { %1832 = vpow2.f32 %v677_v63  ;;  %v670_v7 = vsub.f32 %v1636_v25, %v638_v0  ;;  %v651_v8 = vrot.slane %v650_v1, 1  ;;  %v663_v9 = vrot.slane %v662_v2, 2 }
 0x3e4   :  { %1834 = vpow2.f32 %v675_v3  ;;  %v669_v10 = vsub.f32 %v581_v30, %v631_v4  ;;  %v644_v11 = vrot.slane %v643_v5, 1  ;;  %v655_v12 = vmax.f32 %v653_v49, %v654_v6 }
 0x3e5   :  { %v681_v13 = vmul.f32 1.442695, %v670_v7  ;;  %v652_v14 = vmax.f32 %v650_v1, %v651_v8  ;;  %v664_v15 = vmax.f32 %v662_v2, %v663_v9 }
 0x3e6   :  { %v679_v16 = vmul.f32 1.442695, %v669_v10  ;;  %v645_v17 = vmax.f32 %v643_v5, %v644_v11  ;;  %v656_v18 = vrot.slane %v655_v12, 2 }
 0x3e7   :  { %1836 = vpow2.f32 %v681_v13  ;;  %v672_v19 = vsub.f32 %v1639_v40, %v652_v14  ;;  %v665_v22 = vrot.slane %v664_v15, 1 }
 0x3e8   :  { %1838 = vpow2.f32 %v679_v16  ;;  %v671_v23 = vsub.f32 %v591_v20, %v645_v17  ;;  %v657_v24 = vmax.f32 %v655_v12, %v656_v18 }
 0x3e9   :  { %v685_v26 = vmul.f32 1.442695, %v672_v19  ;;  %v666_v25 = vmax.f32 %v664_v15, %v665_v22 }
 0x3ea   :  { %v683_v27 = vmul.f32 1.442695, %v671_v23  ;;  %v658_v31 = vrot.slane %v657_v24, 1 }
 0x3eb   :  { %1840 = vpow2.f32 %v685_v26  ;;  %v674_v30 = vsub.f32 %v1642_v54, %v666_v25 }
 0x3ec   :  { %1842 = vpow2.f32 %v683_v27  ;;  %v659_v32 = vmax.f32 %v657_v24, %v658_v31 }
 0x3ed   :  { %v2527_v33 = vpop.eup %1832  ;;  %v689_v34 = vmul.f32 1.442695, %v674_v30 }
 0x3ee   :  { %v2529_v35 = vpop.eup %1834  ;;  %v698_v36 = vsel %vm610_vm2, %v2527_v33, 0.0  ;;  %v673_v37 = vsub.f32 %v601_v57, %v659_v32 }
 0x3ef   :  { %v699_v40 = vrot.slane %v698_v36, 4  ;;  %v691_v41 = vsel %vm610_vm2, %v2529_v35, 0.0  ;;  %1844 = vpow2.f32 %v689_v34 }
 0x3f0   :  { %v692_v42 = vrot.slane %v691_v41, 4  ;;  %v687_v43 = vmul.f32 1.442695, %v673_v37 }
 0x3f1   :  { %v2535_v20 = vpop.eup %1836  ;;  %v700_v44 = vadd.f32 %v699_v40, %v698_v36 }
 0x3f2   :  { %v2537_v45 = vpop.eup %1838  ;;  %v693_v46 = vadd.f32 %v692_v42, %v691_v41  ;;  %v712_v47 = vsel %vm610_vm2, %v2535_v20, 0.0  ;;  %1846 = vpow2.f32 %v687_v43 }
 0x3f3   :  { %v701_v50 = vrot.slane %v700_v44, 2  ;;  %v713_v51 = vrot.slane %v712_v47, 4  ;;  %v705_v28 = vsel %vm610_vm2, %v2537_v45, 0.0 }
 0x3f4   :  { %v694_v21 = vrot.slane %v693_v46, 2  ;;  %v706_v52 = vrot.slane %v705_v28, 4 }
 0x3f5   :  { %v2543_v53 = vpop.eup %1840  ;;  %v702_v54 = vadd.f32 %v701_v50, %v700_v44  ;;  %v714_v55 = vadd.f32 %v713_v51, %v712_v47 }
 0x3f6   :  { %v2545_v29 = vpop.eup %1842  ;;  %v695_v56 = vadd.f32 %v694_v21, %v693_v46  ;;  %v707_v38 = vadd.f32 %v706_v52, %v705_v28  ;;  %v726_v57 = vsel %vm610_vm2, %v2543_v53, 0.0 }
 0x3f7   :  { %v703_v58 = vrot.slane %v702_v54, 1  ;;  %v715_v59 = vrot.slane %v714_v55, 2  ;;  %v727_v60 = vrot.slane %v726_v57, 4  ;;  %v719_v39 = vsel %vm610_vm2, %v2545_v29, 0.0 }
 0x3f8   :  { %v696_v48 = vrot.slane %v695_v56, 1  ;;  %v708_v61 = vrot.slane %v707_v38, 2  ;;  %v720_v62 = vrot.slane %v719_v39, 4 }
 0x3f9   :  { %v2551_v49 = vpop.eup %1844  ;;  %v704_v63 = vadd.f32 %v703_v58, %v702_v54  ;;  %v716_v0 = vadd.f32 %v715_v59, %v714_v55  ;;  %v728_v1 = vadd.f32 %v727_v60, %v726_v57  ;;  %v2160_v58 = vmov 0.0   ;;  %v900_v59 = vpop.permute.xlu1 %899 }
 0x3fa   :  { %v697_v2 = vadd.f32 %v696_v48, %v695_v56  ;;  %v709_v3 = vadd.f32 %v708_v61, %v707_v38  ;;  %v721_v4 = vadd.f32 %v720_v62, %v719_v39  ;;  %v740_v5 = vsel %vm610_vm2, %v2551_v49, 0.0  ;;  %v987_v56 = vld [vmem:[%s2736_s9 + $0x10] sm:$0xff]  ;;  %v988_v38 = vld [vmem:[%s2736_s9 + $0x18] sm:$0xff]  ;;  %1665 = vmatprep.mubr.msk.f32.mxu1 %vm2159_vm3, %v2160_v58  ;;  %v898_v48 = vpop.permute.xlu0 %897 }
 0x3fb   :  { %1848 = vrcp.f32 %v704_v63  ;;  %v717_v6 = vrot.slane %v716_v0, 1  ;;  %v729_v7 = vrot.slane %v728_v1, 2  ;;  %v741_v8 = vrot.slane %v740_v5, 4 }
 0x3fc   :  { %v1847_v9 = vpop.eup %1846  ;;  %v710_v10 = vrot.slane %v709_v3, 1  ;;  %v722_v11 = vrot.slane %v721_v4, 2  ;;  %1850 = vrcp.f32 %v697_v2  ;;  %v1756_v57 = vpack.c.bf16 %v988_v38, %v987_v56 }
 0x3fd   :  { %v718_v12 = vadd.f32 %v717_v6, %v716_v0  ;;  %v730_v13 = vadd.f32 %v729_v7, %v728_v1  ;;  %v742_v14 = vadd.f32 %v741_v8, %v740_v5  ;;  %v733_v15 = vsel %vm610_vm2, %v1847_v9, 0.0  ;;  %v904_v60 = vpop.permute.xlu1 %903 }
 0x3fe   :  { %v711_v16 = vadd.f32 %v710_v10, %v709_v3  ;;  %v723_v17 = vadd.f32 %v722_v11, %v721_v4  ;;  %v734_v18 = vrot.slane %v733_v15, 4 }
 0x3ff   :  { %v731_v19 = vrot.slane %v730_v13, 1  ;;  %v743_v22 = vrot.slane %v742_v14, 2  ;;  %1852 = vrcp.f32 %v718_v12 }
 0x400   :  { %v724_v23 = vrot.slane %v723_v17, 1  ;;  %v735_v24 = vadd.f32 %v734_v18, %v733_v15  ;;  %1854 = vrcp.f32 %v711_v16  ;;  %v906_v16 = vpop.permute.xlu0 %905 }
 0x401   :  { %v732_v26 = vadd.f32 %v731_v19, %v730_v13  ;;  %v744_v25 = vadd.f32 %v743_v22, %v742_v14 }
 0x402   :  { %v725_v27 = vadd.f32 %v724_v23, %v723_v17  ;;  %v736_v31 = vrot.slane %v735_v24, 2 }
 0x403   :  { %v745_v30 = vrot.slane %v744_v25, 1  ;;  %1856 = vrcp.f32 %v732_v26 }
 0x404   :  { %v737_v32 = vadd.f32 %v736_v31, %v735_v24  ;;  %1858 = vrcp.f32 %v725_v27 }
 0x405   :  { %v1849_v34 = vpop.eup %1848  ;;  %v746_v36 = vadd.f32 %v745_v30, %v744_v25 }
 0x406   :  { %v1851_v37 = vpop.eup %1850  ;;  %v738_v40 = vrot.slane %v737_v32, 1  ;;  %v756_v42 = vmul.f32 %v1849_v34, %v2527_v33 }
 0x407   :  { %v755_v41 = vmul.f32 %v1851_v37, %v2529_v35  ;;  %1860 = vrcp.f32 %v746_v36 }
 0x408   :  { %v739_v43 = vadd.f32 %v738_v40, %v737_v32 }
 0x409   :  { %v1853_v44 = vpop.eup %1852  ;;  %1645 = vmatprep.mubr.msk.f32.mxu0 %vm610_vm2, %v755_v41 }
 0x40a   :  { %v1855_v46 = vpop.eup %1854  ;;  %1646 = vmatmul.mubr.msk.f32.vlgmr.msra.gmra.mrb[8].mxu0 %vm610_vm2, %v756_v42  ;;  %1862 = vrcp.f32 %v739_v43  ;;  %v758_v50 = vmul.f32 %v1853_v44, %v2535_v20  ;;  %v985_v20 = vld [vmem:[%s2736_s9] sm:$0xff] }
 0x40b   :  { %v757_v47 = vmul.f32 %v1855_v46, %v2537_v45 }
 0x40d   :  { %v1857_v51 = vpop.eup %1856  ;;  %1648 = vmatprep.mubr.msk.f32.mxu0 %vm610_vm2, %v757_v47 }
 0x40e   :  { %v1859_v28 = vpop.eup %1858  ;;  %1649 = vmatmul.mubr.msk.f32.gmra.mrb[10].mxu0 %vm610_vm2, %v758_v50  ;;  %v760_v35 = vmul.f32 %v1857_v51, %v2543_v53  ;;  %v986_v53 = vld [vmem:[%s2736_s9 + $0x8] sm:$0xff]  ;;  %v910_v50 = vpop.permute.xlu0 %909 }
 0x40f   :  { %v759_v33 = vmul.f32 %v1859_v28, %v2545_v29  ;;  %v1753_v55 = vpack.c.bf16 %v986_v53, %v985_v20  ;;  %v2158_v29 = vmov 0.0|0.0  }
 0x410   :  { %1752 = vmatprep.subr.bf16.mxu1 %v2158_v29  ;;  %1764 = vmatprep.subr.bf16.mxu0 %v2158_v29 }
 0x411   :  { %1651 = vmatprep.mubr.msk.f32.mxu0 %vm610_vm2, %v759_v33  ;;  %v1861_v21 = vpop.eup %1860  ;;  %1754 = vmatpush3.bf16.msra.mxu1 %v1753_v55 }
 0x412   :  { %1652 = vmatmul.mubr.msk.f32.gmra.mrb[12].mxu0 %vm610_vm2, %v760_v35  ;;  %v762_v45 = vmul.f32 %v1861_v21, %v2551_v49  ;;  %1755 = vmatprep.subr.bf16.mxu1 %v2158_v29  ;;  %v902_v49 = vpop.permute.xlu1 %901 }
 0x414   :  { %v1863_v52 = vpop.eup %1862 }
 0x415   :  { %v761_v54 = vmul.f32 %v1863_v52, %v1847_v9  ;;  %1757 = vmatpush3.bf16.msra.mxu1 %v1756_v57 }
 0x416   :  { %1758 = vmatprep.subr.bf16.mxu1 %v2158_v29  ;;  %v908_v11 = vpop.permute.xlu1 %907 }
 0x417   :  { %1654 = vmatprep.mubr.msk.f32.mxu0 %vm610_vm2, %v761_v54 }
 0x418   :  { %1655 = vmatmul.mubr.msk.f32.gmra.mrb[14].mxu0 %vm610_vm2, %v762_v45 }
 0x419   :  { %1711 = vmatprep.mubr.msk.f32.mxu0 %vm2159_vm3, %v2160_v58 }
 0x41a   :  { %v912_v42 = vpop.permute.xlu1 %911 }
 0x4dd   :  { %v1647_v39 = vpop.f32.mrb[8].mxu0 }
 0x4de   :  { %v922_v61 = vmul.f32 %v1647_v39, %v900_v59  ;;  %v858_v62 = vpop.f32.mrb[9].mxu0 }
 0x4df   :  { %v921_v63 = vmul.f32 %v898_v48, %v858_v62 }
 0x4e0   :  { %v936_v0 = vsel %vm201_vm0, %v922_v61, 0.0 }
 0x4e1   :  { %v937_v1 = vrot.slane %v936_v0, 4  ;;  %v929_v2 = vsel %vm201_vm0, %v921_v63, 0.0  ;;  %v1650_v3 = vpop.f32.mrb[10].mxu0 }
 0x4e2   :  { %v930_v4 = vrot.slane %v929_v2, 4  ;;  %v924_v5 = vmul.f32 %v1650_v3, %v904_v60  ;;  %v868_v6 = vpop.f32.mrb[11].mxu0 }
 0x4e3   :  { %v938_v7 = vadd.f32 %v937_v1, %v936_v0  ;;  %v923_v8 = vmul.f32 %v902_v49, %v868_v6 }
 0x4e4   :  { %v931_v9 = vadd.f32 %v930_v4, %v929_v2  ;;  %v950_v10 = vsel %vm201_vm0, %v924_v5, 0.0 }
 0x4e5   :  { %v939_v12 = vrot.slane %v938_v7, 2  ;;  %v951_v13 = vrot.slane %v950_v10, 4  ;;  %v943_v14 = vsel %vm201_vm0, %v923_v8, 0.0  ;;  %v1653_v15 = vpop.f32.mrb[12].mxu0 }
 0x4e6   :  { %v932_v17 = vrot.slane %v931_v9, 2  ;;  %v944_v18 = vrot.slane %v943_v14, 4  ;;  %v926_v19 = vmul.f32 %v1653_v15, %v908_v11  ;;  %v878_v22 = vpop.f32.mrb[13].mxu0 }
 0x4e7   :  { %v940_v23 = vadd.f32 %v939_v12, %v938_v7  ;;  %v952_v24 = vadd.f32 %v951_v13, %v950_v10  ;;  %v925_v26 = vmul.f32 %v906_v16, %v878_v22 }
 0x4e8   :  { %v933_v25 = vadd.f32 %v932_v17, %v931_v9  ;;  %v945_v27 = vadd.f32 %v944_v18, %v943_v14  ;;  %v964_v31 = vsel %vm201_vm0, %v926_v19, 0.0  ;;  %v1522_v17 = vld [vmem:[#allocation13] ss:$0 sm:$0xff]  ;;  %v1524_v19 = vld [vmem:[#allocation5] ss:$0 sm:$0xff] }
 0x4e9   :  { %v941_v30 = vrot.slane %v940_v23, 1  ;;  %v953_v32 = vrot.slane %v952_v24, 2  ;;  %v965_v34 = vrot.slane %v964_v31, 4  ;;  %v957_v36 = vsel %vm201_vm0, %v925_v26, 0.0 }
 0x4ea   :  { %v934_v37 = vrot.slane %v933_v25, 1  ;;  %v946_v40 = vrot.slane %v945_v27, 2  ;;  %v958_v41 = vrot.slane %v957_v36, 4 }
 0x4eb   :  { %v942_v43 = vadd.f32 %v941_v30, %v940_v23  ;;  %v954_v44 = vadd.f32 %v953_v32, %v952_v24  ;;  %v966_v46 = vadd.f32 %v965_v34, %v964_v31  ;;  %v1656_v47 = vpop.f32.mrb[14].mxu0  ;;  %v1127_v34 = vld [vmem:[%s2740_s13] sm:$0xff] }
 0x4ec   :  { %v935_v51 = vadd.f32 %v934_v37, %v933_v25  ;;  %v947_v28 = vadd.f32 %v946_v40, %v945_v27  ;;  %v959_v33 = vadd.f32 %v958_v41, %v957_v36  ;;  %v928_v35 = vmul.f32 %v1656_v47, %v912_v42  ;;  %v888_v21 = vpop.f32.mrb[15].mxu0  ;;  %v1128_v36 = vld [vmem:[%s2740_s13 + $0x8] sm:$0xff]  ;;  %v1129_v40 = vld [vmem:[%s2740_s13 + $0x10] sm:$0xff]  ;;  %v1130_v41 = vld [vmem:[%s2740_s13 + $0x18] sm:$0xff] }
 0x4ed   :  { %v955_v52 = vrot.slane %v954_v44, 1  ;;  %v967_v54 = vrot.slane %v966_v46, 2  ;;  %v927_v45 = vmul.f32 %v910_v50, %v888_v21  ;;  %v1759_v37 = vpack.c.bf16 %v1128_v36, %v1127_v34  ;;  %v1219_v50 = vld [vmem:[%s2742_s15 + $0x18] sm:$0xff] }
 0x4ee   :  { %v1005_v20 = vsel %vm1004_vm4, %v942_v43, %v935_v51  ;;  %v948_v53 = vrot.slane %v947_v28, 1  ;;  %v960_v55 = vrot.slane %v959_v33, 2  ;;  %v978_v56 = vsel %vm201_vm0, %v928_v35, 0.0  ;;  %v1216_v43 = vld [vmem:[%s2742_s15] sm:$0xff]  ;;  %v1529_v34 = vld [vmem:[#allocation19] ss:$0 sm:$0xff] }
 0x4ef   :  { %v968_v38 = vadd.f32 %v967_v54, %v966_v46  ;;  %v979_v57 = vrot.slane %v978_v56, 4  ;;  %v971_v59 = vsel %vm201_vm0, %v927_v45, 0.0  ;;  %v956_v61 = vadd.f32 %v955_v52, %v954_v44  ;;  %v1217_v44 = vld [vmem:[%s2742_s15 + $0x8] sm:$0xff]  ;;  %v1218_v46 = vld [vmem:[%s2742_s15 + $0x10] sm:$0xff] }
 0x4f0   :  { %v949_v60 = vadd.f32 %v948_v53, %v947_v28  ;;  %v961_v39 = vadd.f32 %v960_v55, %v959_v33  ;;  %v972_v48 = vrot.slane %v971_v59, 4  ;;  %v1762_v42 = vpack.c.bf16 %v1130_v41, %v1129_v40  ;;  %v1220_v28 = vld [vmem:[%s2742_s15 + $0x20] sm:$0xff]  ;;  %v1221_v33 = vld [vmem:[%s2742_s15 + $0x28] sm:$0xff]  ;;  %v1526_v55 = vld [vmem:[#allocation16] ss:$0 sm:$0xff] }
 0x4f1   :  { %v969_v62 = vrot.slane %v968_v38, 1  ;;  %v980_v49 = vadd.f32 %v979_v57, %v978_v56  ;;  %v1765_v47 = vpack.c.bf16 %v1217_v44, %v1216_v43  ;;  %v1768_v51 = vpack.c.bf16 %v1219_v50, %v1218_v46  ;;  %v1222_v57 = vld [vmem:[%s2742_s15 + $0x30] sm:$0xff]  ;;  %v1532_v43 = vld [vmem:[%s2746_s19] ss:$0 sm:$0xff] }
 0x4f2   :  { %v1007_v63 = vsel %vm1006_vm5, %v949_v60, %v1005_v20  ;;  %v962_v0 = vrot.slane %v961_v39, 1  ;;  %v973_v1 = vadd.f32 %v972_v48, %v971_v59  ;;  %v1771_v35 = vpack.c.bf16 %v1221_v33, %v1220_v28  ;;  %v1525_v20 = vld [vmem:[#allocation14] ss:$0 sm:$0xff]  ;;  %v1223_v59 = vld [vmem:[%s2742_s15 + $0x38] sm:$0xff]  ;;  %v1225_v48 = vld [vmem:[%s2742_s15 + $0x48] sm:$0xff] }
 0x4f3   :  { %v1009_v2 = vsel %vm1008_vm6, %v956_v61, %v1007_v63  ;;  %v981_v3 = vrot.slane %v980_v49, 2  ;;  %v970_v6 = vadd.f32 %v969_v62, %v968_v38  ;;  %1766 = vmatpush3.bf16.msra.mxu0 %v1765_v47  ;;  %v1774_v60 = vpack.c.bf16 %v1223_v59, %v1222_v57  ;;  %v1226_v62 = vld [vmem:[%s2742_s15 + $0x50] sm:$0xff] }
 0x4f4   :  { %v963_v4 = vadd.f32 %v962_v0, %v961_v39  ;;  %v974_v5 = vrot.slane %v973_v1, 2  ;;  %1767 = vmatprep.subr.bf16.mxu0 %v2158_v29  ;;  %v1224_v39 = vld [vmem:[%s2742_s15 + $0x40] sm:$0xff] }
 0x4f5   :  { %v982_v7 = vadd.f32 %v981_v3, %v980_v49  ;;  %v1777_v61 = vpack.c.bf16 %v1225_v48, %v1224_v39  ;;  %v1227_v49 = vld [vmem:[%s2742_s15 + $0x58] sm:$0xff]  ;;  %v1228_v0 = vld [vmem:[%s2742_s15 + $0x60] sm:$0xff]  ;;  %v1230_v3 = vld [vmem:[%s2742_s15 + $0x70] sm:$0xff] }
 0x4f6   :  { %v1011_v8 = vsel %vm1010_vm7, %v963_v4, %v1009_v2  ;;  %v975_v9 = vadd.f32 %v974_v5, %v973_v1  ;;  %v1780_v63 = vpack.c.bf16 %v1227_v49, %v1226_v62  ;;  %v1229_v1 = vld [vmem:[%s2742_s15 + $0x68] sm:$0xff]  ;;  %v1231_v4 = vld [vmem:[%s2742_s15 + $0x78] sm:$0xff] }
 0x4f7   :  { %v983_v10 = vrot.slane %v982_v7, 1  ;;  %v1013_v11 = vsel %vm1012_vm8, %v970_v6, %v1011_v8  ;;  %1769 = vmatpush3.bf16.msra.mxu0 %v1768_v51  ;;  %v1783_v2 = vpack.c.bf16 %v1229_v1, %v1228_v0  ;;  %v1786_v5 = vpack.c.bf16 %v1231_v4, %v1230_v3  ;;  %v1315_v6 = vld [vmem:[%s2745_s18] sm:$0xff]  ;;  %v1317_v8 = vld [vmem:[%s2745_s18 + $0x10] sm:$0xff] }
 0x4f8   :  { %v976_v12 = vrot.slane %v975_v9, 1  ;;  %1770 = vmatprep.subr.bf16.mxu0 %v2158_v29 }
 0x4f9   :  { %v984_v14 = vadd.f32 %v983_v10, %v982_v7  ;;  %v1316_v7 = vld [vmem:[%s2745_s18 + $0x8] sm:$0xff]  ;;  %v1318_v10 = vld [vmem:[%s2745_s18 + $0x18] sm:$0xff] }
 0x4fa   :  { %v977_v13 = vadd.f32 %v976_v12, %v975_v9  ;;  %v1789_v9 = vpack.c.bf16 %v1316_v7, %v1315_v6  ;;  %v1311_v12 = vld [vmem:[%s2744_s17] sm:$0xff] }
 0x4fb   :  { %1772 = vmatpush3.bf16.msra.mxu0 %v1771_v35 }
 0x4fc   :  { %v1015_v15 = vsel %vm1014_vm9, %v977_v13, %v1013_v11  ;;  %1773 = vmatprep.subr.bf16.mxu0 %v2158_v29  ;;  %v1792_v11 = vpack.c.bf16 %v1318_v10, %v1317_v8  ;;  %v1312_v13 = vld [vmem:[%s2744_s17 + $0x8] sm:$0xff] }
 0x4fd   :  { %v1017_v16 = vsel %vm1016_vm10, %v984_v14, %v1015_v15  ;;  %v1310_v14 = vld [vmem:[#allocation2] sm:$0xff]  ;;  %v1795_v15 = vpack.c.bf16 %v1312_v13, %v1311_v12 }
 0x4fe   :  { %1666 = vmatmul.mubr.msk.f32.vlgmr.msra.gmra.mrb[8].mxu1 %vm201_vm0, %v1017_v16  ;;  %v1527_v16 = vld [vmem:[#allocation17] ss:$0 sm:$0xff] }
 0x4ff   :  { %1676 = vmatprep.mubr.msk.f32.mxu1 %vm2159_vm3, %v2160_v58  ;;  %1760 = vmatpush3.bf16.msra.mxu1 %v1759_v37 }
 0x500   :  { %1761 = vmatprep.subr.bf16.mxu1 %v2158_v29  ;;  %1775 = vmatpush3.bf16.msra.mxu0 %v1774_v60 }
 0x501   :  { %1776 = vmatprep.subr.bf16.mxu0 %v2158_v29 }
 0x503   :  { %1763 = vmatpush3.bf16.msra.mxu1 %v1762_v42 }
 0x504   :  { %1788 = vmatprep.subr.bf16.mxu1 %v2158_v29  ;;  %1778 = vmatpush3.bf16.msra.mxu0 %v1777_v61 }
 0x505   :  { %1779 = vmatprep.subr.bf16.mxu0 %v2158_v29 }
 0x508   :  { %1781 = vmatpush3.bf16.msra.mxu0 %v1780_v63 }
 0x509   :  { %1782 = vmatprep.subr.bf16.mxu0 %v2158_v29 }
 0x50c   :  { %1784 = vmatpush3.bf16.msra.mxu0 %v1783_v2 }
 0x50d   :  { %1785 = vmatprep.subr.bf16.mxu0 %v2158_v29 }
 0x510   :  { %1787 = vmatpush3.bf16.msra.mxu0 %v1786_v5 }
 0x5d1   :  { %v1086_v18 = vpop.f32.mrb[8].mxu1 }
 0x5d2   :  { %v1087_v22 = vadd.f32 %v1522_v17, %v1086_v18  ;;  %v1667_v23 = vpop.f32.mrb[9].mxu1 }
 0x5d4   :  { %v2602_v24 = vadd.f32 %v1524_v19, %v1087_v22 }
 0x5d6   :  { %v1098_v26 = vsel %vm201_vm0, %v2602_v24, 0.0 }
 0x5d7   :  { %1099 = vadd.xlane.f32.xlu0 %v1098_v26 }
 0x664   :  { %v1100_v25 = vpop.xlane.xlu0 %1099 }
 0x665   :  { %v1101_v27 = vmul.f32 0.03125, %v1100_v25 }
 0x667   :  { %v1102_v31 = vsub.f32 %v2602_v24, %v1101_v27 }
 0x669   :  { %v1103_v30 = vmul.f32 %v1102_v31, %v1102_v31 }
 0x66b   :  { %v1104_v32 = vsel %vm201_vm0, %v1103_v30, 0.0 }
 0x66c   :  { %1105 = vadd.xlane.f32.xlu1 %v1104_v32 }
 0x6f9   :  { %v1106_v21 = vpop.xlane.xlu1 %1105 }
 0x6fa   :  { %v1107_v52 = vmul.f32 0.03125, %v1106_v21 }
 0x6fc   :  { %v1108_v54 = vadd.f32 1e-05, %v1107_v52 }
 0x6fe   :  { %1864 = vrsqrt.f32 %v1108_v54 }
 0x708   :  { %v1865_v45 = vpop.eup %1864 }
 0x709   :  { %v1110_v53 = vmul.f32 %v1865_v45, %v1102_v31  ;;  %v1313_v31 = vld [vmem:[%s2744_s17 + $0x10] sm:$0xff] }
 0x70b   :  { %v1118_v56 = vmul.f32 %v1525_v20, %v1110_v53 }
 0x70d   :  { %v1126_v38 = vadd.f32 %v1526_v55, %v1118_v56 }
 0x70f   :  { %1677 = vmatmul.mubr.msk.f32.vlgmr.msra.gmra.mrb[10].mxu1 %vm201_vm0, %v1126_v38 }
 0x710   :  { %1722 = vmatprep.mubr.msk.f32.mxu1 %vm2159_vm3, %v2160_v58  ;;  %1790 = vmatpush3.bf16.msra.mxu1 %v1789_v9 }
 0x711   :  { %1791 = vmatprep.subr.bf16.mxu1 %v2158_v29 }
 0x714   :  { %1793 = vmatpush3.bf16.msra.mxu1 %v1792_v11 }
 0x715   :  { %1794 = vmatprep.subr.bf16.mxu1 %v2158_v29 }
 0x717   :  { %1723 = vmatmul.mubr.msk.f32.vlgmr.msra.gmra.mrb[12].mxu1 %vm201_vm0, %v1310_v14 }
 0x718   :  { %1796 = vmatpush3.bf16.msra.mxu1 %v1795_v15  ;;  %1733 = vmatprep.mubr.msk.f32.mxu1 %vm2159_vm3, %v2160_v58  ;;  %v1314_v58 = vld [vmem:[%s2744_s17 + $0x18] sm:$0xff]  ;;  %s2110_s17 = scalar_lea.vmem %s1481_s4, 128 }
 0x719   :  { %1797 = vmatprep.subr.bf16.mxu1 %v2158_v29  ;;  %v1798_v29 = vpack.c.bf16 %v1314_v58, %v1313_v31  ;;  %p2111_p4 = scmp.ne.s32.totalorder %s1481_s4, %s2110_s17  ;;  %p2116_p6 = scmp.lt.s32.totalorder %s2110_s17, %s2110_s17 }
 0x71b   :  { %p2117_p7 = por %p2116_p6, %p2115_p5 }
 0x71c   :  { %1799 = vmatpush3.bf16.msra.mxu1 %v1798_v29 }
 0x71d   :  { %p2118_p8 = pnand %p2117_p7, %p2111_p4 }
 0x7e2   :  { %v1207_v17 = vpop.f32.mrb[10].mxu1 }
 0x7e3   :  { %v1208_v18 = vadd.f32 %v1527_v16, %v1207_v17  ;;  %v1678_v19 = vpop.f32.mrb[11].mxu1 }
 0x7e5   :  { %v1212_v22 = vmul.f32 0.70710677, %v1208_v18  ;;  %v1211_v26 = vmul.f32 0.5, %v1208_v18 }
 0x7e7   :  { %1866 = verf.f32 %v1212_v22 }
 0x7ea   :  { %v1388_v30 = vpop.f32.mrb[12].mxu1 }
 0x7eb   :  { %v1724_v32 = vpop.f32.mrb[13].mxu1 }
 0x7f1   :  { %v1867_v23 = vpop.eup %1866 }
 0x7f2   :  { %v1214_v25 = vadd.f32 1.0, %v1867_v23 }
 0x7f4   :  { %v1215_v27 = vmul.f32 %v1214_v25, %v1211_v26 }
 0x7f6   :  { %1712 = vmatmul.mubr.f32.vlgmr.msra.gmra.mrb[16].mxu0 %v1215_v27 }
 0x8c9   :  { %v1305_v36 = vpop.f32.mrb[16].mxu0 }
 0x8ca   :  { %v1306_v37 = vadd.f32 %v1529_v34, %v1305_v36  ;;  %v1713_v40 = vpop.f32.mrb[17].mxu0 }
 0x8cc   :  { %v1309_v41 = vadd.f32 %v1306_v37, %v2602_v24 }
 0x8ce   :  { %1734 = vmatmul.mubr.msk.f32.vlgmr.msra.gmra.mrb[14].mxu1 %vm201_vm0, %v1309_v41 }
 0x9a1   :  { %v1461_v42 = vpop.f32.mrb[14].mxu1 }
 0x9a2   :  { %v1462_v44 = vadd.f32 %v1461_v42, %v1388_v30  ;;  %v1735_v46 = vpop.f32.mrb[15].mxu1 }
 0x9a4   :  { %v1472_v47 = vadd.f32 %v1532_v43, %v1462_v44 }
 0x9a6   :  { %1473 = vst [vmem:[#allocation20] sm:$0xff] %v1472_v47 }
 0x9a7   :  { %2121 = shalt.err (!%p2118_p8)
}
 0x9a8   :  { %s2122_s8 = scalar_lea.hbm %s2747_s20, 128 }
 0x9a9   :  { %p2123_p9 = scmp.ne.s32.totalorder %s2747_s20, %s2122_s8  ;;  %p2126_p10 = scmp.lt.u32.totalorder %s2122_s8, %s2747_s20 }
 0x9ab   :  { %p2128_p11 = pnand %p2126_p10, %p2123_p9 }
 0x9ad   :  { %2131 = shalt.err (!%p2128_p11)
}
 0x9ae   :  { %1483 = dma.vmem_to_hbm [thread:$0]  %s1481_s4, 128, %s2747_s20, [#allocation4]  }
 0x9af   :  { %2144 = dma.done.wait [#allocation4], 128  }
 0x9b0   :  { %2145 = vsyncadd [#allocation4], 4294967168 }
 0x9b1   :  { %1487 = vsyncpa [#allocation3], 1 }
 0x9b2   :  { %1488 = vsyncpa [#allocation6], 1 }
 0x9b3   :  { %1489 = vsyncpa [#allocation9], 1 }
 0x9b4   :  { %1490 = vsyncpa [#allocation12], 1 }
 0x9b5   :  { %1491 = vsyncpa [#allocation15], 1 }
 0x9b6   :  { %1492 = vsyncpa [#allocation18], 1 }
 0x9b7   :  { %1493 = vsyncpa [#allocation4], 1 }

</bundles_post_ra>
